<compile_context>
chip_gen: v6e
topology: v6e:2x2x1
jax: 0.10.0
libtpu: 0.0.40
codegen_flags: <defaults>
</compile_context>

<pallas_src>
import functools

import numpy as np
import jax
import jax.numpy as jnp
from jax import lax
from jax.experimental import pallas as pl
from jax.experimental.pallas import tpu as pltpu


def _round_up(x, m):
    return (x + m - 1) // m * m


def _make_dft_matrices(N, M, mp):
    """Forward truncated-rfft matrix (2*mp, N) = [cos; -sin] and inverse-rfft
    matrix (N, 2*mp) = [ai^T | bi^T] reproducing torch.fft.irfft(out_ft, n=N)
    with modes >= M implicitly zero.  Built in float64, cast by the caller."""
    n = np.arange(N, dtype=np.float64)
    k = np.arange(M, dtype=np.float64)
    ang = 2.0 * np.pi * np.outer(k, n) / N                  # (M, N)

    cfst = np.zeros((2 * mp, N), np.float64)
    cfst[:M] = np.cos(ang)                                  # Re X_k =  x @ cos
    cfst[mp:mp + M] = -np.sin(ang)                          # Im X_k = -(x @ sin)

    # irfft ('backward' norm, Hermitian reconstruction):
    #   x_n = (1/N)[Re X_0 + 2*sum_{0<k<N/2}(Re X_k cos - Im X_k sin)
    #               + Re X_{N/2} (-1)^n]           (Im of DC / Nyquist ignored)
    c = np.full((M,), 2.0)
    c[0] = 1.0
    if N % 2 == 0 and M - 1 == N // 2:
        c[-1] = 1.0
    ai = (c[:, None] * np.cos(ang)) / N                     # multiplies Re(out_ft)
    bi = (-c[:, None] * np.sin(ang)) / N                    # multiplies Im(out_ft)

    aibt = np.zeros((N, 2 * mp), np.float64)
    aibt[:, :M] = ai.T
    aibt[:, mp:mp + M] = bi.T
    return cfst, aibt


def _spectral_conv1d_kernel(x_ref, cfst_ref, wr_ref, wi_ref, aibt_ref, o_ref,
                            ori_ref, *, mp, bb, cin, cout, cdt, x_natural):
    f32 = jnp.float32

    # --- forward truncated rfft: one MXU matmul -> (2*mp, bb*cin) f32 ---------
    if x_natural:
        # x block (bb, cin, N), cin sublane-aligned: flatten is layout-free.
        xn = x_ref[...].reshape(bb * cin, x_ref.shape[-1])   # (bb*cin, N)
        xri = lax.dot_general(cfst_ref[...], xn,
                              (((1,), (1,)), ((), ())),
                              preferred_element_type=f32)    # (2*mp, bb*cin)
    else:
        # x block (1, N, bb*cin), pre-transposed in the wrapper (cin < sublane).
        xri = jnp.dot(cfst_ref[...], x_ref[0],
                      preferred_element_type=f32)            # (2*mp, bb*cin)

    # rows [0:mp) = Re X, rows [mp:2mp) = Im X ; lanes ordered (batch-major, cin)
    xr = xri[:mp].reshape(mp, bb, cin).astype(cdt)
    xi = xri[mp:].reshape(mp, bb, cin).astype(cdt)

    # --- per-mode complex channel mixing on the MXU (mode-batched dots) -------
    wr = wr_ref[...]                                         # (mp, cin, cout)
    wi = wi_ref[...]
    dn = (((2,), (1,)), ((0,), (0,)))                        # contract cin, batch modes
    o_re = (lax.dot_general(xr, wr, dn, preferred_element_type=f32)
            - lax.dot_general(xi, wi, dn, preferred_element_type=f32))
    o_im = (lax.dot_general(xr, wi, dn, preferred_element_type=f32)
            + lax.dot_general(xi, wr, dn, preferred_element_type=f32))
    # each (mp, bb, cout), f32

    # --- assemble spectral block in a VMEM scratch (no concatenate copy) ------
    ori_ref[0:mp, :] = o_re.reshape(mp, bb * cout).astype(cdt)
    ori_ref[mp:2 * mp, :] = o_im.reshape(mp, bb * cout).astype(cdt)

    # --- irfft, transposed: one MXU matmul -> (bb*cout, N), lane-dense N ------
    out_t = lax.dot_general(ori_ref[...], aibt_ref[...],
                            (((0,), (1,)), ((), ())),
                            preferred_element_type=f32)      # (bb*cout, N)
    o_ref[0] = out_t.astype(o_ref.dtype)


def spectral_conv1d(x, w_real, w_imag, *, compute_dtype=jnp.float32,
                    lane_target=256):
    """x: (B, Cin, N) f32; w_real/w_imag: (Cin, Cout, M) f32 -> (B, Cout, N) f32.

    lane_target: target matmul lane width bb*Cin (256 for the v6e/v7x 256x256
    MXU; 128 already saturates v5e's 128x128 MXUs)."""
    B, Cin, N = x.shape
    _, Cout, M = w_real.shape

    cdt = jnp.dtype(compute_dtype)
    itemsize = cdt.itemsize
    sub = 8 if itemsize == 4 else 16           # sublane tile (f32: 8, bf16: 16)
    mp = _round_up(M, sub)                     # tile-align the mode axis

    # Batch block: bb*Cin matmul lanes; keep nb >= 2 when B >= 2 so the
    # "parallel" batch-block axis can be sharded across v7x's two TensorCores.
    bb = max(1, min(B, -(-lane_target // Cin)))
    nb = -(-B // bb)
    if nb == 1 and B >= 2:
        bb = -(-B // 2)
        nb = -(-B // bb)
    Bp = nb * bb

    # Natural x layout only if the in-kernel (bb, Cin, N) -> (bb*Cin, N) flatten
    # stays within whole sublane tiles; otherwise pre-transpose in the wrapper.
    x_natural = (Cin % sub == 0)

    # ------ plain-JAX layout plumbing (no compute hoisted out of the kernel) --
    cfst_np, aibt_np = _make_dft_matrices(N, M, mp)
    cfst = jnp.asarray(cfst_np, cdt)                         # (2mp, N)
    aibt = jnp.asarray(aibt_np, cdt)                         # (N, 2mp)

    def _pad_modes(w):     # (Cin, Cout, M) -> (mp, Cin, Cout), zero-padded modes
        wm = jnp.transpose(w, (2, 0, 1))
        return jnp.pad(wm, ((0, mp - M), (0, 0), (0, 0))).astype(cdt)

    wr_m = _pad_modes(w_real)
    wi_m = _pad_modes(w_imag)

    xp = x if Bp == B else jnp.pad(x, ((0, Bp - B), (0, 0), (0, 0)))
    if x_natural:
        x_in = xp.astype(cdt)                                # (Bp, Cin, N), no HBM pass for f32
        x_spec = pl.BlockSpec((bb, Cin, N), lambda b: (b, 0, 0))
    else:
        # (Bp, Cin, N) -> (nb, N, bb*Cin); per block, lanes ordered (batch, cin)
        x_in = (xp.reshape(nb, bb, Cin, N)
                  .transpose(0, 3, 1, 2)
                  .reshape(nb, N, bb * Cin)
                  .astype(cdt))
        x_spec = pl.BlockSpec((1, N, bb * Cin), lambda b: (b, 0, 0))

    # ------ VMEM budget -> vmem_limit_bytes ------------------------------------
    const_bytes = itemsize * (2 * mp * N + N * 2 * mp + 2 * mp * Cin * Cout)
    block_bytes = (2 * itemsize * bb * Cin * N          # x block (double-buffered)
                   + 2 * 4 * bb * Cout * N              # out block f32 (double-buffered)
                   + itemsize * 2 * mp * bb * Cout)     # ori scratch
    needed = const_bytes + block_bytes
    try:
        vmem_cap = int(pltpu.get_tpu_info().vmem_capacity_bytes)
    except Exception:                                    # noqa: BLE001
        vmem_cap = 64 * 1024 * 1024                      # conservative (v7x per-TC)
    vmem_limit = int(min(0.9 * vmem_cap,
                         max(1.25 * needed + (2 << 20), 32 << 20)))

    # ------ honest scheduler hint (constants counted once) ---------------------
    flops = nb * (2 * (2 * mp) * N * bb * Cin           # forward DFT
                  + 4 * 2 * mp * bb * Cin * Cout        # complex channel mixing
                  + 2 * N * (2 * mp) * bb * Cout)       # inverse DFT
    bytes_accessed = (itemsize * Bp * Cin * N            # x read once
                      + const_bytes                      # DFT matrices + weights once
                      + 4 * Bp * Cout * N)               # output written once

    kernel = functools.partial(_spectral_conv1d_kernel,
                               mp=mp, bb=bb, cin=Cin, cout=Cout,
                               cdt=cdt, x_natural=x_natural)

    def _run(single_buffer_consts):
        pm = {"pipeline_mode": pl.Buffered(1)} if single_buffer_consts else {}
        in_specs = [
            x_spec,
            pl.BlockSpec((2 * mp, N), lambda b: (0, 0), **pm),          # fwd DFT
            pl.BlockSpec((mp, Cin, Cout), lambda b: (0, 0, 0), **pm),   # W real
            pl.BlockSpec((mp, Cin, Cout), lambda b: (0, 0, 0), **pm),   # W imag
            pl.BlockSpec((N, 2 * mp), lambda b: (0, 0), **pm),          # inv DFT
        ]
        return pl.pallas_call(
            kernel,
            out_shape=jax.ShapeDtypeStruct((nb, bb * Cout, N), jnp.float32),
            grid_spec=pltpu.PrefetchScalarGridSpec(
                num_scalar_prefetch=0,
                grid=(nb,),
                in_specs=in_specs,
                out_specs=pl.BlockSpec((1, bb * Cout, N), lambda b: (b, 0, 0)),
                scratch_shapes=[pltpu.VMEM((2 * mp, bb * Cout), cdt)]),
            compiler_params=pltpu.CompilerParams(
                dimension_semantics=("parallel",),
                vmem_limit_bytes=vmem_limit),
            cost_estimate=pl.CostEstimate(
                flops=int(flops),
                transcendentals=0,
                bytes_accessed=int(bytes_accessed)),
        )(x_in, cfst, wr_m, wi_m, aibt)

    try:
        out = _run(True)            # single-buffered grid-invariant operands
    except Exception:               # noqa: BLE001 — fall back to default buffering
        out = _run(False)

    # (nb, bb*Cout, N) -> (B, Cout, N): pure reshape, no transpose HBM pass.
    return out.reshape(Bp, Cout, N)[:B]


def reference(x, w_real, w_imag):
    """Plain-JAX reference mirroring the PyTorch forward."""
    x_ft = jnp.fft.rfft(x)                                  # (B, Cin, N//2+1) c64
    M = w_real.shape[-1]
    w = w_real.astype(jnp.complex64) + 1j * w_imag.astype(jnp.complex64)
    out_ft = jnp.einsum('bix,iox->box', x_ft[:, :, :M], w)  # (B, Cout, M)
    return jnp.fft.irfft(out_ft, n=x.shape[-1])             # (B, Cout, N) f32


if __name__ == "__main__":
    key = jax.random.PRNGKey(0)

    # --- Test 1: module config in_channels=4, out_channels=4, modes=8, N=16 ---
    # Cin=4 < 8 -> wrapper-transposed x path.
    B, Cin, Cout, N, modes = 2, 4, 4, 16, 8
    scale = 1.0 / (Cin * Cout)
    k1, k2, k3, key = jax.random.split(key, 4)
    x = jax.random.normal(k1, (B, Cin, N), dtype=jnp.float32)
    w_real = scale * jax.random.uniform(k2, (Cin, Cout, modes), dtype=jnp.float32)
    w_imag = scale * jax.random.uniform(k3, (Cin, Cout, modes), dtype=jnp.float32)

    ref = jax.block_until_ready(reference(x, w_real, w_imag))

    out = jax.block_until_ready(spectral_conv1d(x, w_real, w_imag))
    assert out.shape == (B, Cout, N) and out.dtype == jnp.float32
    assert np.allclose(np.asarray(out), np.asarray(ref), atol=2e-4, rtol=1e-3), \
        "Pallas SpectralConv1d (f32, transposed-x path) mismatch vs FFT reference"

    # bf16 MXU operands with f32 accumulation: looser check (bf16 rounding of
    # x / DFT matrices / weights).
    out_bf16 = jax.block_until_ready(
        spectral_conv1d(x, w_real, w_imag, compute_dtype=jnp.bfloat16))
    assert out_bf16.shape == (B, Cout, N)
    assert np.allclose(np.asarray(out_bf16), np.asarray(ref), atol=5e-2, rtol=5e-2), \
        "Pallas SpectralConv1d (bf16) mismatch vs FFT reference"

    # --- Test 2: Cin sublane-aligned -> natural x layout (no wrapper transpose)
    B2, Cin2, Cout2, N2, modes2 = 4, 8, 8, 32, 12
    scale2 = 1.0 / (Cin2 * Cout2)
    k4, k5, k6, key = jax.random.split(key, 4)
    x2 = jax.random.normal(k4, (B2, Cin2, N2), dtype=jnp.float32)
    w2r = scale2 * jax.random.uniform(k5, (Cin2, Cout2, modes2), dtype=jnp.float32)
    w2i = scale2 * jax.random.uniform(k6, (Cin2, Cout2, modes2), dtype=jnp.float32)

    ref2 = jax.block_until_ready(reference(x2, w2r, w2i))
    out2 = jax.block_until_ready(spectral_conv1d(x2, w2r, w2i))
    assert out2.shape == (B2, Cout2, N2) and out2.dtype == jnp.float32
    assert np.allclose(np.asarray(out2), np.asarray(ref2), atol=2e-3, rtol=1e-2), \
        "Pallas SpectralConv1d (f32, natural-x path) mismatch vs FFT reference"

    print("KERNEL_OK")
</pallas_src>

<mosaic_0001>
module attributes {stable_mosaic.version = 11 : i64} {
  func.func @_spectral_conv1d_kernel(%arg0: i32, %arg1: memref<1x16x4xf32, #tpu.memory_space<vmem>>, %arg2: memref<16x16xf32, #tpu.memory_space<vmem>>, %arg3: memref<8x4x4xf32, #tpu.memory_space<vmem>>, %arg4: memref<8x4x4xf32, #tpu.memory_space<vmem>>, %arg5: memref<16x16xf32, #tpu.memory_space<vmem>>, %arg6: memref<1x4x16xf32, #tpu.memory_space<vmem>>, %arg7: memref<16x4xf32, #tpu.memory_space<vmem>>) attributes {dimension_semantics = [#tpu.dimension_semantics<parallel>], iteration_bounds = array<i64: 2>, scalar_prefetch = 0 : i64, scratch_operands = 1 : i64, tpu.core_type = #tpu.core_type<tc>, window_params = [{transform_indices = @transform_0, window_bounds = array<i64: 1, 16, 4>}, {pipeline_mode = #tpu.pipeline_mode<synchronous>, transform_indices = @transform_1, window_bounds = array<i64: 16, 16>}, {pipeline_mode = #tpu.pipeline_mode<synchronous>, transform_indices = @transform_2, window_bounds = array<i64: 8, 4, 4>}, {pipeline_mode = #tpu.pipeline_mode<synchronous>, transform_indices = @transform_3, window_bounds = array<i64: 8, 4, 4>}, {pipeline_mode = #tpu.pipeline_mode<synchronous>, transform_indices = @transform_4, window_bounds = array<i64: 16, 16>}, {transform_indices = @transform_5, window_bounds = array<i64: 1, 4, 16>}]} {
    %c0 = arith.constant 0 : index
    %c0_0 = arith.constant 0 : index
    %0 = vector.load %arg2[%c0, %c0_0] : memref<16x16xf32, #tpu.memory_space<vmem>>, vector<16x16xf32>
    %c0_1 = arith.constant 0 : index
    %c0_2 = arith.constant 0 : index
    %c0_3 = arith.constant 0 : index
    %1 = vector.load %arg1[%c0_1, %c0_2, %c0_3] : memref<1x16x4xf32, #tpu.memory_space<vmem>>, vector<1x16x4xf32>
    %2 = vector.shape_cast %1 : vector<1x16x4xf32> to vector<16x4xf32>
    %cst = arith.constant dense<0.000000e+00> : vector<16x4xf32>
    %3 = tpu.matmul %0, %2, %cst {dimension_numbers = #tpu.dot_dimension_numbers<[1], [0], [0], [1], [0, 0, 1, 1], [], []>} : vector<16x16xf32>, vector<16x4xf32>, vector<16x4xf32> -> vector<16x4xf32>
    %4 = vector.extract_strided_slice %3 {offsets = [0, 0], sizes = [8, 4], strides = [1, 1]} : vector<16x4xf32> to vector<8x4xf32>
    %5 = vector.shape_cast %4 : vector<8x4xf32> to vector<8x1x4xf32>
    %6 = vector.extract_strided_slice %3 {offsets = [8, 0], sizes = [8, 4], strides = [1, 1]} : vector<16x4xf32> to vector<8x4xf32>
    %7 = vector.shape_cast %6 : vector<8x4xf32> to vector<8x1x4xf32>
    %c0_4 = arith.constant 0 : index
    %c0_5 = arith.constant 0 : index
    %c0_6 = arith.constant 0 : index
    %8 = vector.load %arg3[%c0_4, %c0_5, %c0_6] : memref<8x4x4xf32, #tpu.memory_space<vmem>>, vector<8x4x4xf32>
    %c0_7 = arith.constant 0 : index
    %c0_8 = arith.constant 0 : index
    %c0_9 = arith.constant 0 : index
    %9 = vector.load %arg4[%c0_7, %c0_8, %c0_9] : memref<8x4x4xf32, #tpu.memory_space<vmem>>, vector<8x4x4xf32>
    %cst_10 = arith.constant dense<0.000000e+00> : vector<8x1x4xf32>
    %10 = tpu.matmul %5, %8, %cst_10 {dimension_numbers = #tpu.dot_dimension_numbers<[2], [1], [1], [2], [0, 0, 0, 1, 1, 2], [0], [0]>} : vector<8x1x4xf32>, vector<8x4x4xf32>, vector<8x1x4xf32> -> vector<8x1x4xf32>
    %cst_11 = arith.constant dense<0.000000e+00> : vector<8x1x4xf32>
    %11 = tpu.matmul %7, %9, %cst_11 {dimension_numbers = #tpu.dot_dimension_numbers<[2], [1], [1], [2], [0, 0, 0, 1, 1, 2], [0], [0]>} : vector<8x1x4xf32>, vector<8x4x4xf32>, vector<8x1x4xf32> -> vector<8x1x4xf32>
    %12 = arith.subf %10, %11 : vector<8x1x4xf32>
    %cst_12 = arith.constant dense<0.000000e+00> : vector<8x1x4xf32>
    %13 = tpu.matmul %5, %9, %cst_12 {dimension_numbers = #tpu.dot_dimension_numbers<[2], [1], [1], [2], [0, 0, 0, 1, 1, 2], [0], [0]>} : vector<8x1x4xf32>, vector<8x4x4xf32>, vector<8x1x4xf32> -> vector<8x1x4xf32>
    %cst_13 = arith.constant dense<0.000000e+00> : vector<8x1x4xf32>
    %14 = tpu.matmul %7, %8, %cst_13 {dimension_numbers = #tpu.dot_dimension_numbers<[2], [1], [1], [2], [0, 0, 0, 1, 1, 2], [0], [0]>} : vector<8x1x4xf32>, vector<8x4x4xf32>, vector<8x1x4xf32> -> vector<8x1x4xf32>
    %15 = arith.addf %13, %14 : vector<8x1x4xf32>
    %16 = vector.shape_cast %12 : vector<8x1x4xf32> to vector<8x4xf32>
    %c0_14 = arith.constant 0 : index
    %c0_15 = arith.constant 0 : index
    %17 = vector.load %arg7[%c0_14, %c0_15] : memref<16x4xf32, #tpu.memory_space<vmem>>, vector<8x4xf32>
    tpu.vector_store %arg7[%c0_14, %c0_15], %16 {strides = array<i32>} : memref<16x4xf32, #tpu.memory_space<vmem>>, vector<8x4xf32>,
    %18 = vector.shape_cast %15 : vector<8x1x4xf32> to vector<8x4xf32>
    %c8 = arith.constant 8 : index
    %c0_16 = arith.constant 0 : index
    %19 = vector.load %arg7[%c8, %c0_16] : memref<16x4xf32, #tpu.memory_space<vmem>>, vector<8x4xf32>
    tpu.vector_store %arg7[%c8, %c0_16], %18 {strides = array<i32>} : memref<16x4xf32, #tpu.memory_space<vmem>>, vector<8x4xf32>,
    %c0_17 = arith.constant 0 : index
    %c0_18 = arith.constant 0 : index
    %20 = vector.load %arg7[%c0_17, %c0_18] : memref<16x4xf32, #tpu.memory_space<vmem>>, vector<16x4xf32>
    %c0_19 = arith.constant 0 : index
    %c0_20 = arith.constant 0 : index
    %21 = vector.load %arg5[%c0_19, %c0_20] : memref<16x16xf32, #tpu.memory_space<vmem>>, vector<16x16xf32>
    %cst_21 = arith.constant dense<0.000000e+00> : vector<4x16xf32>
    %22 = tpu.matmul %20, %21, %cst_21 {dimension_numbers = #tpu.dot_dimension_numbers<[0], [1], [1], [0], [0, 1, 1, 0], [], []>} : vector<16x4xf32>, vector<16x16xf32>, vector<4x16xf32> -> vector<4x16xf32>
    %c0_22 = arith.constant 0 : index
    %c0_23 = arith.constant 0 : index
    %c0_24 = arith.constant 0 : index
    %23 = vector.load %arg6[%c0_22, %c0_23, %c0_24] : memref<1x4x16xf32, #tpu.memory_space<vmem>>, vector<1x4x16xf32>
    %24 = vector.shape_cast %23 : vector<1x4x16xf32> to vector<4x16xf32>
    %25 = vector.shape_cast %22 : vector<4x16xf32> to vector<1x4x16xf32>
    tpu.vector_store %arg6[%c0_22, %c0_23, %c0_24], %25 {strides = array<i32>} : memref<1x4x16xf32, #tpu.memory_space<vmem>>, vector<1x4x16xf32>,
    return
  }
  func.func @transform_0(%arg0: i32) -> (i32, i32, i32) {
    %c0_i32 = arith.constant 0 : i32
    %c0_i32_0 = arith.constant 0 : i32
    %c0_i32_1 = arith.constant 0 : i32
    return %arg0, %c0_i32, %c0_i32_0 : i32, i32, i32
  }
  func.func @transform_1(%arg0: i32) -> (i32, i32) {
    %c0_i32 = arith.constant 0 : i32
    %c0_i32_0 = arith.constant 0 : i32
    %c0_i32_1 = arith.constant 0 : i32
    return %c0_i32, %c0_i32_0 : i32, i32
  }
  func.func @transform_2(%arg0: i32) -> (i32, i32, i32) {
    %c0_i32 = arith.constant 0 : i32
    %c0_i32_0 = arith.constant 0 : i32
    %c0_i32_1 = arith.constant 0 : i32
    %c0_i32_2 = arith.constant 0 : i32
    return %c0_i32, %c0_i32_0, %c0_i32_1 : i32, i32, i32
  }
  func.func @transform_3(%arg0: i32) -> (i32, i32, i32) {
    %c0_i32 = arith.constant 0 : i32
    %c0_i32_0 = arith.constant 0 : i32
    %c0_i32_1 = arith.constant 0 : i32
    %c0_i32_2 = arith.constant 0 : i32
    return %c0_i32, %c0_i32_0, %c0_i32_1 : i32, i32, i32
  }
  func.func @transform_4(%arg0: i32) -> (i32, i32) {
    %c0_i32 = arith.constant 0 : i32
    %c0_i32_0 = arith.constant 0 : i32
    %c0_i32_1 = arith.constant 0 : i32
    return %c0_i32, %c0_i32_0 : i32, i32
  }
  func.func @transform_5(%arg0: i32) -> (i32, i32, i32) {
    %c0_i32 = arith.constant 0 : i32
    %c0_i32_0 = arith.constant 0 : i32
    %c0_i32_1 = arith.constant 0 : i32
    return %arg0, %c0_i32, %c0_i32_0 : i32, i32, i32
  }
}

module attributes {stable_mosaic.version = 11 : i64} {
  func.func @_spectral_conv1d_kernel(%arg0: i32, %arg1: memref<1x16x4xf32, #tpu.memory_space<vmem>>, %arg2: memref<16x16xf32, #tpu.memory_space<vmem>>, %arg3: memref<8x4x4xf32, #tpu.memory_space<vmem>>, %arg4: memref<8x4x4xf32, #tpu.memory_space<vmem>>, %arg5: memref<16x16xf32, #tpu.memory_space<vmem>>, %arg6: memref<1x4x16xf32, #tpu.memory_space<vmem>>, %arg7: memref<16x4xf32, #tpu.memory_space<vmem>>) attributes {dimension_semantics = [#tpu.dimension_semantics<parallel>], iteration_bounds = array<i64: 2>, scalar_prefetch = 0 : i64, scratch_operands = 1 : i64, tpu.core_type = #tpu.core_type<tc>, window_params = [{transform_indices = @transform_0, window_bounds = array<i64: 1, 16, 4>}, {pipeline_mode = #tpu.pipeline_mode<synchronous>, transform_indices = @transform_1, window_bounds = array<i64: 16, 16>}, {pipeline_mode = #tpu.pipeline_mode<synchronous>, transform_indices = @transform_2, window_bounds = array<i64: 8, 4, 4>}, {pipeline_mode = #tpu.pipeline_mode<synchronous>, transform_indices = @transform_3, window_bounds = array<i64: 8, 4, 4>}, {pipeline_mode = #tpu.pipeline_mode<synchronous>, transform_indices = @transform_4, window_bounds = array<i64: 16, 16>}, {transform_indices = @transform_5, window_bounds = array<i64: 1, 4, 16>}]} {
    %c0 = arith.constant 0 : index
    %c0_0 = arith.constant 0 : index
    %0 = vector.load %arg2[%c0, %c0_0] : memref<16x16xf32, #tpu.memory_space<vmem>>, vector<16x16xf32>
    %c0_1 = arith.constant 0 : index
    %c0_2 = arith.constant 0 : index
    %c0_3 = arith.constant 0 : index
    %1 = vector.load %arg1[%c0_1, %c0_2, %c0_3] : memref<1x16x4xf32, #tpu.memory_space<vmem>>, vector<1x16x4xf32>
    %2 = vector.shape_cast %1 : vector<1x16x4xf32> to vector<16x4xf32>
    %cst = arith.constant dense<0.000000e+00> : vector<16x4xf32>
    %3 = tpu.matmul %0, %2, %cst {dimension_numbers = #tpu.dot_dimension_numbers<[1], [0], [0], [1], [0, 0, 1, 1], [], []>} : vector<16x16xf32>, vector<16x4xf32>, vector<16x4xf32> -> vector<16x4xf32>
    %4 = vector.extract_strided_slice %3 {offsets = [0, 0], sizes = [8, 4], strides = [1, 1]} : vector<16x4xf32> to vector<8x4xf32>
    %5 = vector.shape_cast %4 : vector<8x4xf32> to vector<8x1x4xf32>
    %6 = vector.extract_strided_slice %3 {offsets = [8, 0], sizes = [8, 4], strides = [1, 1]} : vector<16x4xf32> to vector<8x4xf32>
    %7 = vector.shape_cast %6 : vector<8x4xf32> to vector<8x1x4xf32>
    %c0_4 = arith.constant 0 : index
    %c0_5 = arith.constant 0 : index
    %c0_6 = arith.constant 0 : index
    %8 = vector.load %arg3[%c0_4, %c0_5, %c0_6] : memref<8x4x4xf32, #tpu.memory_space<vmem>>, vector<8x4x4xf32>
    %c0_7 = arith.constant 0 : index
    %c0_8 = arith.constant 0 : index
    %c0_9 = arith.constant 0 : index
    %9 = vector.load %arg4[%c0_7, %c0_8, %c0_9] : memref<8x4x4xf32, #tpu.memory_space<vmem>>, vector<8x4x4xf32>
    %cst_10 = arith.constant dense<0.000000e+00> : vector<8x1x4xf32>
    %10 = tpu.matmul %5, %8, %cst_10 {dimension_numbers = #tpu.dot_dimension_numbers<[2], [1], [1], [2], [0, 0, 0, 1, 1, 2], [0], [0]>} : vector<8x1x4xf32>, vector<8x4x4xf32>, vector<8x1x4xf32> -> vector<8x1x4xf32>
    %cst_11 = arith.constant dense<0.000000e+00> : vector<8x1x4xf32>
    %11 = tpu.matmul %7, %9, %cst_11 {dimension_numbers = #tpu.dot_dimension_numbers<[2], [1], [1], [2], [0, 0, 0, 1, 1, 2], [0], [0]>} : vector<8x1x4xf32>, vector<8x4x4xf32>, vector<8x1x4xf32> -> vector<8x1x4xf32>
    %12 = arith.subf %10, %11 : vector<8x1x4xf32>
    %cst_12 = arith.constant dense<0.000000e+00> : vector<8x1x4xf32>
    %13 = tpu.matmul %5, %9, %cst_12 {dimension_numbers = #tpu.dot_dimension_numbers<[2], [1], [1], [2], [0, 0, 0, 1, 1, 2], [0], [0]>} : vector<8x1x4xf32>, vector<8x4x4xf32>, vector<8x1x4xf32> -> vector<8x1x4xf32>
    %cst_13 = arith.constant dense<0.000000e+00> : vector<8x1x4xf32>
    %14 = tpu.matmul %7, %8, %cst_13 {dimension_numbers = #tpu.dot_dimension_numbers<[2], [1], [1], [2], [0, 0, 0, 1, 1, 2], [0], [0]>} : vector<8x1x4xf32>, vector<8x4x4xf32>, vector<8x1x4xf32> -> vector<8x1x4xf32>
    %15 = arith.addf %13, %14 : vector<8x1x4xf32>
    %16 = vector.shape_cast %12 : vector<8x1x4xf32> to vector<8x4xf32>
    %c0_14 = arith.constant 0 : index
    %c0_15 = arith.constant 0 : index
    %17 = vector.load %arg7[%c0_14, %c0_15] : memref<16x4xf32, #tpu.memory_space<vmem>>, vector<8x4xf32>
    tpu.vector_store %arg7[%c0_14, %c0_15], %16 {strides = array<i32>} : memref<16x4xf32, #tpu.memory_space<vmem>>, vector<8x4xf32>,
    %18 = vector.shape_cast %15 : vector<8x1x4xf32> to vector<8x4xf32>
    %c8 = arith.constant 8 : index
    %c0_16 = arith.constant 0 : index
    %19 = vector.load %arg7[%c8, %c0_16] : memref<16x4xf32, #tpu.memory_space<vmem>>, vector<8x4xf32>
    tpu.vector_store %arg7[%c8, %c0_16], %18 {strides = array<i32>} : memref<16x4xf32, #tpu.memory_space<vmem>>, vector<8x4xf32>,
    %c0_17 = arith.constant 0 : index
    %c0_18 = arith.constant 0 : index
    %20 = vector.load %arg7[%c0_17, %c0_18] : memref<16x4xf32, #tpu.memory_space<vmem>>, vector<16x4xf32>
    %c0_19 = arith.constant 0 : index
    %c0_20 = arith.constant 0 : index
    %21 = vector.load %arg5[%c0_19, %c0_20] : memref<16x16xf32, #tpu.memory_space<vmem>>, vector<16x16xf32>
    %cst_21 = arith.constant dense<0.000000e+00> : vector<4x16xf32>
    %22 = tpu.matmul %20, %21, %cst_21 {dimension_numbers = #tpu.dot_dimension_numbers<[0], [1], [1], [0], [0, 1, 1, 0], [], []>} : vector<16x4xf32>, vector<16x16xf32>, vector<4x16xf32> -> vector<4x16xf32>
    %c0_22 = arith.constant 0 : index
    %c0_23 = arith.constant 0 : index
    %c0_24 = arith.constant 0 : index
    %23 = vector.load %arg6[%c0_22, %c0_23, %c0_24] : memref<1x4x16xf32, #tpu.memory_space<vmem>>, vector<1x4x16xf32>
    %24 = vector.shape_cast %23 : vector<1x4x16xf32> to vector<4x16xf32>
    %25 = vector.shape_cast %22 : vector<4x16xf32> to vector<1x4x16xf32>
    tpu.vector_store %arg6[%c0_22, %c0_23, %c0_24], %25 {strides = array<i32>} : memref<1x4x16xf32, #tpu.memory_space<vmem>>, vector<1x4x16xf32>,
    return
  }
  func.func @transform_0(%arg0: i32) -> (i32, i32, i32) {
    %c0_i32 = arith.constant 0 : i32
    %c0_i32_0 = arith.constant 0 : i32
    %c0_i32_1 = arith.constant 0 : i32
    return %arg0, %c0_i32, %c0_i32_0 : i32, i32, i32
  }
  func.func @transform_1(%arg0: i32) -> (i32, i32) {
    %c0_i32 = arith.constant 0 : i32
    %c0_i32_0 = arith.constant 0 : i32
    %c0_i32_1 = arith.constant 0 : i32
    return %c0_i32, %c0_i32_0 : i32, i32
  }
  func.func @transform_2(%arg0: i32) -> (i32, i32, i32) {
    %c0_i32 = arith.constant 0 : i32
    %c0_i32_0 = arith.constant 0 : i32
    %c0_i32_1 = arith.constant 0 : i32
    %c0_i32_2 = arith.constant 0 : i32
    return %c0_i32, %c0_i32_0, %c0_i32_1 : i32, i32, i32
  }
  func.func @transform_3(%arg0: i32) -> (i32, i32, i32) {
    %c0_i32 = arith.constant 0 : i32
    %c0_i32_0 = arith.constant 0 : i32
    %c0_i32_1 = arith.constant 0 : i32
    %c0_i32_2 = arith.constant 0 : i32
    return %c0_i32, %c0_i32_0, %c0_i32_1 : i32, i32, i32
  }
  func.func @transform_4(%arg0: i32) -> (i32, i32) {
    %c0_i32 = arith.constant 0 : i32
    %c0_i32_0 = arith.constant 0 : i32
    %c0_i32_1 = arith.constant 0 : i32
    return %c0_i32, %c0_i32_0 : i32, i32
  }
  func.func @transform_5(%arg0: i32) -> (i32, i32, i32) {
    %c0_i32 = arith.constant 0 : i32
    %c0_i32_0 = arith.constant 0 : i32
    %c0_i32_1 = arith.constant 0 : i32
    return %arg0, %c0_i32, %c0_i32_0 : i32, i32, i32
  }
}

</mosaic_0001>

<bundles_post_ra>
// kernel: tpu_custom_call.1
= control target key start
LH: loop header
LB: loop body
LE: loop exit
PB: predicated region body
PF: predicated region fallthrough
CT: control target
= control target key end

     0   :  { %10 = vsyncpa [#allocation4], 0  ;;  %s3925_s0 = inlined_call_operand.vmem [shape: f32[2,16,4], index: 0, kind: input, shape index: {}]   ;;  %s3926_s1 = inlined_call_operand.vmem [shape: f32[16,16], index: 1, kind: input, shape index: {}]   ;;  %s3927_s2 = inlined_call_operand.vmem [shape: f32[8,4,4], index: 2, kind: input, shape index: {}]   ;;  %s3928_s3 = inlined_call_operand.vmem [shape: f32[8,4,4], index: 3, kind: input, shape index: {}]   ;;  %s3929_s4 = inlined_call_operand.vmem [shape: f32[16,16], index: 4, kind: input, shape index: {}]   ;;  %s3930_s5 = inlined_call_operand.hbm [shape: f32[2,4,16], index: 5, kind: output, shape index: {}]  }
   0x1   :  { %12 = vsyncpa [#allocation4 + $0x1], 0  ;;  %s3464_s18 = smov 0   ;;  %s3466_s19 = smov 0  }
   0x2   :  { %s3468_s20 = smov 0   ;;  %s3470_s21 = smov 0  }
   0x3 LB: > { %s3485_s22 = sadd.s32 4294967295, %s3428_s21   ;;  %s3000_s23 = sadd.s32 4294967294, %s3428_s21   ;;  %s3428_s21 = sphi %s3470_s21, %s3936_s21   ;;  %s3424_s20 = sphi %s3468_s20, %s3935_s20   ;;  %s3420_s19 = sphi %s3466_s19, %s3934_s19   ;;  %s3416_s18 = sphi %s3464_s18, %s3933_s18  }
   0x4   : > { %s3489_s24 = sadd.s32 1, %s3428_s21   ;;  %s135_s25 = sadd.s32 1, %s3424_s20 }
   0x5   : > { %s132_s26 = ssub.s32 %s3428_s21, %s3489_s24  ;;  %p145_p0 = scmp.ne.s32.totalorder %s3424_s20, %s3420_s19 }
   0x6   : > { %p133_p1 = scmp.eq.s32.totalorder %s132_s26, 0  ;;  %p146_p2 = scmp.eq.s32.totalorder %s3485_s22, 1 }
   0x7   : > { %p151_p3 = scmp.ne.s32.totalorder %s3420_s19, %s3416_s18  ;;  %p152_p4 = scmp.eq.s32.totalorder %s3000_s23, 1 }
   0x8   : > { %s3500_s27 = scalar_select %p133_p1, %s3424_s20, %s135_s25  }
   0x9   : > { %p3502_p5 = por %p146_p2, %p145_p0  ;;  %p3506_p6 = por %p152_p4, %p151_p3 }
   0xa   : > { %p3003_p7 = scmp.ge.s32.totalorder %s3428_s21, 1  ;;  %p190_p8 = scmp.lt.s32.totalorder %s3428_s21, 3 }
   0xc   : > { %p191_p9 = pnand %p3003_p7, %p190_p8 }
   0xd   : > { %p218_p10 = scmp.lt.s32.totalorder (!%p191_p9), %s3485_s22, 1  ;;  %s215_s23 = sand.u32 (!%p191_p9), 1, %s3420_s19  }
   0xe   : > { %194 = sbr.rel (%p191_p9) target bundleno = 829 (0x33d), region = 40  ;;  %s3004_s25 = sshll.u32 (!%p191_p9), %s215_s23, 2 }
   0xf   : > { %s3077_s26 = sshll.u32 (!%p191_p9), %s3485_s22, 6  ;;  %s217_s30 = scalar_lea.vmem (!%p191_p9), [#allocation3], %s3004_s25 }
  0x10   : > { %s2941_s6 = sshll.u32 (!%p191_p9), %s217_s30, 4  ;;  %s3884_s9 = scalar_lea.hbm (!%p191_p9), %s3930_s5, %s3077_s26  ;;  %s3886_s6 = int_to_ptr.vmem [resolvable:$true] %s2941_s6 }
  0x11   : > { %s2928_s10 = scalar_lea.sflag (!%p191_p9), [#allocation4], %s215_s23 }
  0x13   : > { %v223_v0 = vld [vmem:[%s3926_s1] sm:$0xff]  ;;  %vm227_vm0 = vcmask 130048   ;;  %s219_s7 = scalar_select %p218_p10, %s3485_s22, 1  ;;  %v224_v3 = vld [vmem:[%s3926_s1 + $0x8] sm:$0xff]  ;;  %v3430_v4 = vmov 0.0   ;;  %vm428_vm1 = vcmask 1043456   ;;  %v314_v9 = vlaneseq }
  0x14   : > { %3156 = vmatprep.mubr.msk.f32.mxu0 %vm227_vm0, %v223_v0  ;;  %3159 = vmatprep.subr.mxu1 %v3430_v4  ;;  %v3529_v5 = vld [vmem:[%s3927_s2] sm:$0xf]  ;;  %vm3431_vm2 = vmmov 0   ;;  %v3540_v6 = vld [vmem:[%s3927_s2 + $0x10] sm:$0xf]  ;;  %vm425_vm3 = vcmask 31744  }
  0x15   : > { %s3080_s8 = sshll.u32 %s219_s7, 4  ;;  %3160 = vmatpush3.msk.msra.mxu1 %vm428_vm1, %v3529_v5  ;;  %3161 = vmatprep.mubr.msk.f32.mxu1 %vm3431_vm2, %v3430_v4  ;;  %v3432_v7 = vmov 1966171168   ;;  %v315_v11 = vshrl.u32 %v314_v9, 7  ;;  %v3557_v20 = vld [vmem:[%s3927_s2 + $0x4] sm:$0xf] }
  0x16   : > { %s222_s11 = scalar_lea.vmem %s3925_s0, %s3080_s8  ;;  %3164 = vmatprep.subr.mxu1 %v3430_v4  ;;  %v312_v8 = vunpack.c.l.s4 %v3432_v7  ;;  %v3567_v22 = vld [vmem:[%s3927_s2 + $0x18] sm:$0xf]  ;;  %v3582_v24 = vld [vmem:[%s3927_s2 + $0x8] sm:$0xf]  ;;  %v3599_v27 = vld [vmem:[%s3928_s3] sm:$0xf] }
  0x17   : > { %v226_v1 = vld [vmem:[%s222_s11 + $0x8] sm:$0xff]  ;;  %v225_v2 = vld [vmem:[%s222_s11] sm:$0xff]  ;;  %v3643_v35 = vld [vmem:[%s3927_s2 + $0x14] sm:$0xf]  ;;  %vm2764_vm4 = vcmask 1041409   ;;  %vm2767_vm5 = vcmask 1042434  }
  0x18   : > { %3152 = vmatprep.subr.mxu0 %v226_v1  ;;  %v313_v10 = vunpack.c.0.s8 %v312_v8  ;;  %v3615_v29 = vld [vmem:[%s3927_s2 + $0xc] sm:$0xf]  ;;  %v3628_v32 = vld [vmem:[%s3928_s3 + $0x8] sm:$0xf]  ;;  %v3656_v38 = vld [vmem:[%s3928_s3 + $0x10] sm:$0xf] }
  0x19   : > { %3153 = vmatpush3.msra.mxu0 %v226_v1  ;;  %v3670_v40 = vld [vmem:[%s3927_s2 + $0x1c] sm:$0xf]  ;;  %v3683_v42 = vld [vmem:[%s3928_s3 + $0x18] sm:$0xf]  ;;  %v3698_v45 = vld [vmem:[%s3928_s3 + $0x4] sm:$0xf] }
  0x1a   : > { %3154 = vmatprep.subr.mxu0 %v225_v2  ;;  %v3547_v13 = vsub.s32 %v313_v10, %v315_v11  ;;  %v3717_v48 = vld [vmem:[%s3928_s3 + $0xc] sm:$0xf]  ;;  %v3734_v51 = vld [vmem:[%s3928_s3 + $0x14] sm:$0xf]  ;;  %v424_v53 = vld [vmem:[%s3928_s3 + $0x1c] sm:$0xf] }
  0x1b   : > { %3155 = vmatpush3.msra.mxu0 %v225_v2  ;;  %v2813_v55 = vld [vmem:[%s3929_s4 + $0x8] sm:$0xff]  ;;  %v2812_v56 = vld [vmem:[%s3929_s4] sm:$0xff]  ;;  %vm2770_vm6 = vcmask 1043459   ;;  %vm2773_vm7 = vcmask 1044484   ;;  %vm2776_vm8 = vcmask 1045509   ;;  %vm2779_vm9 = vcmask 1046534  }
  0x1c   : > { %3157 = vmatmul.mubr.msk.f32.vlgmr.msra.gmra.mxu0 %vm227_vm0, %v224_v3  ;;  %3179 = vmatprep.subr.mxu0 %v3430_v4  ;;  %vm2782_vm10 = vcmask 1047559   ;;  %vm2925_vm11 = vcmask 125952   ;;  %s3368_s11 = scalar_lea.vmem %s3886_s6, 64  ;;  %s3433_s22 = smov [#allocation3]  }
  0x1d   : > { %3181 = vmatprep.mubr.msk.f32.mxu0 %vm3431_vm2, %v3430_v4  ;;  %3180 = vmatpush3.msk.msra.mxu0 %vm428_vm1, %v3540_v6  ;;  %p3369_p11 = scmp.ne.s32.totalorder %s3886_s6, %s3368_s11  ;;  %s3372_s12 = sshll.u32 %s3433_s22, 4  ;;  %s3373_s12 = int_to_ptr.vmem [resolvable:$false] %s3372_s12 }
  0x1e   : > { %3189 = vmatprep.subr.mxu0 %v3430_v4  ;;  %s3374_s13 = scalar_lea.vmem %s3373_s12, 128  ;;  %p3375_p0 = scmp.lt.s32.totalorder %s3886_s6, %s3373_s12 }
  0x1f   : > { %p3370_p12 = pnand %p3369_p11, %p3502_p5  ;;  %p3376_p1 = scmp.lt.s32.totalorder %s3374_s13, %s3368_s11 }
  0x21   : > { %p3371_p13 = pneg %p3370_p12  ;;  %p3377_p2 = por %p3376_p1, %p3375_p0 }
  0x23   : > { %p3378_p3 = pnand %p3377_p2, %p3371_p13 }
  0xdc   : > { %v3158_v12 = vpop.f32.mrf.mxu0 }
  0xdd   : > { %v367_v25 = vrot.slane %v3158_v12, %v3547_v13  ;;  %v360_v30 = vcombine.high %v3158_v12, %v3158_v12 }
  0xde   : > { %v300_v14 = vpop.f32.mrf.mxu0 }
  0xdf   : > { %v310_v15 = vcombine.high %v300_v14, %v300_v14  ;;  %v317_v16 = vrot.slane %v300_v14, %v3547_v13  ;;  %v383_v31 = vrot.slane %v367_v25, %v3547_v13  ;;  %v374_v36 = vrot.slane %v360_v30, %v3547_v13 }
  0xe0   : > { %v375_v43 = vcombine.high %v367_v25, %v367_v25 }
  0xe1   : > { %v324_v17 = vrot.slane %v310_v15, %v3547_v13  ;;  %v325_v18 = vcombine.high %v317_v16, %v317_v16  ;;  %v3552_v19 = vrot.slane %v317_v16, %v3547_v13  ;;  %v405_v37 = vcombine.high %v383_v31, %v383_v31 }
  0xe2   : > { %v390_v41 = vrot.slane %v374_v36, %v3547_v13  ;;  %v397_v47 = vrot.slane %v375_v43, %v3547_v13  ;;  %v376_v49 = vcombine.high %v374_v36, %v374_v36 }
  0xe3   : > { %v3560_v21 = vrot.slane %v324_v17, %v3547_v13  ;;  %3162 = vmatmul.mubr.msk.f32.vlgmr.msra.gmra.mxu1 %vm425_vm3, %v3552_v19  ;;  %v3574_v23 = vrot.slane %v325_v18, %v3547_v13  ;;  %v3607_v28 = vcombine.high %v3552_v19, %v3552_v19  ;;  %v326_v33 = vcombine.high %v324_v17, %v324_v17 }
  0xe4   : > { %3165 = vmatpush3.msk.msra.mxu1 %vm428_vm1, %v3557_v20  ;;  %3166 = vmatprep.mubr.msk.f32.mxu1 %vm3431_vm2, %v3430_v4  ;;  %v406_v46 = vcombine.high %v390_v41, %v390_v41  ;;  %v407_v50 = vcombine.high %v397_v47, %v397_v47  ;;  %v404_v52 = vrot.slane %v376_v49, %v3547_v13 }
  0xe5   : > { %3182 = vmatmul.mubr.msk.f32.vlgmr.msra.gmra.mxu0 %vm425_vm3, %v3560_v21  ;;  %3169 = vmatprep.subr.mxu1 %v3430_v4  ;;  %v3591_v26 = vcombine.high %v3560_v21, %v3560_v21  ;;  %v3636_v34 = vcombine.high %v3574_v23, %v3574_v23  ;;  %v3663_v39 = vrot.slane %v326_v33, %v3547_v13 }
  0xe6   : > { %3190 = vmatpush3.msk.msra.mxu0 %vm428_vm1, %v3567_v22  ;;  %3191 = vmatprep.mubr.msk.f32.mxu0 %vm3431_vm2, %v3430_v4  ;;  %v408_v54 = vcombine.high %v404_v52, %v404_v52 }
  0xe7   : > { %3167 = vmatmul.mubr.msk.f32.vlgmr.msra.gmra.mxu1 %vm425_vm3, %v3574_v23  ;;  %3199 = vmatprep.subr.mxu0 %v3430_v4  ;;  %v3693_v44 = vcombine.high %v3663_v39, %v3663_v39 }
  0xe8   : > { %3170 = vmatpush3.msk.msra.mxu1 %vm428_vm1, %v3582_v24  ;;  %3171 = vmatprep.mubr.msk.f32.mxu1 %vm3431_vm2, %v3430_v4 }
  0xe9   : > { %3192 = vmatmul.mubr.msk.f32.vlgmr.msra.gmra.mxu0 %vm425_vm3, %v3591_v26  ;;  %3174 = vmatprep.subr.mxu1 %v3430_v4 }
  0xea   : > { %3200 = vmatpush3.msk.msra.mxu0 %vm428_vm1, %v3599_v27  ;;  %3201 = vmatprep.mubr.msk.f32.mxu0 %vm3431_vm2, %v3430_v4 }
  0xeb   : > { %3172 = vmatmul.mubr.msk.f32.vlgmr.msra.gmra.mxu1 %vm425_vm3, %v3607_v28  ;;  %3209 = vmatprep.subr.mxu0 %v3430_v4 }
  0xec   : > { %3175 = vmatpush3.msk.msra.mxu1 %vm428_vm1, %v3615_v29  ;;  %3176 = vmatprep.mubr.msk.f32.mxu1 %vm3431_vm2, %v3430_v4 }
  0xed   : > { %3202 = vmatmul.mubr.msk.f32.vlgmr.msra.gmra.mxu0 %vm425_vm3, %v383_v31  ;;  %3184 = vmatprep.subr.mxu1 %v3430_v4 }
  0xee   : > { %3210 = vmatpush3.msk.msra.mxu0 %vm428_vm1, %v3628_v32  ;;  %3211 = vmatprep.mubr.msk.f32.mxu0 %vm3431_vm2, %v3430_v4 }
  0xef   : > { %3177 = vmatmul.mubr.msk.f32.vlgmr.msra.gmra.mxu1 %vm425_vm3, %v3636_v34  ;;  %3219 = vmatprep.subr.mxu0 %v3430_v4 }
  0xf0   : > { %3185 = vmatpush3.msk.msra.mxu1 %vm428_vm1, %v3643_v35  ;;  %3186 = vmatprep.mubr.msk.f32.mxu1 %vm3431_vm2, %v3430_v4 }
  0xf1   : > { %3212 = vmatmul.mubr.msk.f32.vlgmr.msra.gmra.mxu0 %vm425_vm3, %v405_v37  ;;  %3194 = vmatprep.subr.mxu1 %v3430_v4 }
  0xf2   : > { %3220 = vmatpush3.msk.msra.mxu0 %vm428_vm1, %v3656_v38  ;;  %3221 = vmatprep.mubr.msk.f32.mxu0 %vm3431_vm2, %v3430_v4 }
  0xf3   : > { %3187 = vmatmul.mubr.msk.f32.vlgmr.msra.gmra.mxu1 %vm425_vm3, %v3663_v39  ;;  %3229 = vmatprep.subr.mxu0 %v3430_v4 }
  0xf4   : > { %3195 = vmatpush3.msk.msra.mxu1 %vm428_vm1, %v3670_v40  ;;  %3196 = vmatprep.mubr.msk.f32.mxu1 %vm3431_vm2, %v3430_v4 }
  0xf5   : > { %3222 = vmatmul.mubr.msk.f32.vlgmr.msra.gmra.mxu0 %vm425_vm3, %v390_v41  ;;  %3204 = vmatprep.subr.mxu1 %v3430_v4 }
  0xf6   : > { %3230 = vmatpush3.msk.msra.mxu0 %vm428_vm1, %v3683_v42  ;;  %3231 = vmatprep.mubr.msk.f32.mxu0 %vm3431_vm2, %v3430_v4 }
  0xf7   : > { %3197 = vmatmul.mubr.msk.f32.vlgmr.msra.gmra.mxu1 %vm425_vm3, %v3693_v44  ;;  %3239 = vmatprep.subr.mxu0 %v3430_v4 }
  0xf8   : > { %3205 = vmatpush3.msk.msra.mxu1 %vm428_vm1, %v3698_v45  ;;  %3206 = vmatprep.mubr.msk.f32.mxu1 %vm3431_vm2, %v3430_v4 }
  0xf9   : > { %3232 = vmatmul.mubr.msk.f32.vlgmr.msra.gmra.mxu0 %vm425_vm3, %v406_v46  ;;  %3214 = vmatprep.subr.mxu1 %v3430_v4 }
  0xfa   : > { %3240 = vmatpush3.msk.msra.mxu0 %vm428_vm1, %v3529_v5  ;;  %3241 = vmatprep.mubr.msk.f32.mxu0 %vm3431_vm2, %v3430_v4 }
  0xfb   : > { %3207 = vmatmul.mubr.msk.f32.vlgmr.msra.gmra.mxu1 %vm425_vm3, %v397_v47  ;;  %3249 = vmatprep.subr.mxu0 %v3430_v4 }
  0xfc   : > { %3215 = vmatpush3.msk.msra.mxu1 %vm428_vm1, %v3717_v48  ;;  %3216 = vmatprep.mubr.msk.f32.mxu1 %vm3431_vm2, %v3430_v4 }
  0xfd   : > { %3242 = vmatmul.mubr.msk.f32.vlgmr.msra.gmra.mxu0 %vm425_vm3, %v383_v31  ;;  %3224 = vmatprep.subr.mxu1 %v3430_v4 }
  0xfe   : > { %3250 = vmatpush3.msk.msra.mxu0 %vm428_vm1, %v3582_v24  ;;  %3251 = vmatprep.mubr.msk.f32.mxu0 %vm3431_vm2, %v3430_v4 }
  0xff   : > { %3217 = vmatmul.mubr.msk.f32.vlgmr.msra.gmra.mxu1 %vm425_vm3, %v407_v50  ;;  %3259 = vmatprep.subr.mxu0 %v3430_v4 }
 0x100   : > { %3225 = vmatpush3.msk.msra.mxu1 %vm428_vm1, %v3734_v51  ;;  %3226 = vmatprep.mubr.msk.f32.mxu1 %vm3431_vm2, %v3430_v4 }
 0x101   : > { %3252 = vmatmul.mubr.msk.f32.vlgmr.msra.gmra.mxu0 %vm425_vm3, %v405_v37  ;;  %3234 = vmatprep.subr.mxu1 %v3430_v4 }
 0x102   : > { %3260 = vmatpush3.msk.msra.mxu0 %vm428_vm1, %v3540_v6  ;;  %3261 = vmatprep.mubr.msk.f32.mxu0 %vm3431_vm2, %v3430_v4 }
 0x103   : > { %3227 = vmatmul.mubr.msk.f32.vlgmr.msra.gmra.mxu1 %vm425_vm3, %v404_v52  ;;  %3269 = vmatprep.subr.mxu0 %v3430_v4 }
 0x104   : > { %3235 = vmatpush3.msk.msra.mxu1 %vm428_vm1, %v424_v53  ;;  %3236 = vmatprep.mubr.msk.f32.mxu1 %vm3431_vm2, %v3430_v4 }
 0x105   : > { %3262 = vmatmul.mubr.msk.f32.vlgmr.msra.gmra.mxu0 %vm425_vm3, %v390_v41  ;;  %3244 = vmatprep.subr.mxu1 %v3430_v4 }
 0x106   : > { %3270 = vmatpush3.msk.msra.mxu0 %vm428_vm1, %v3567_v22  ;;  %3271 = vmatprep.mubr.msk.f32.mxu0 %vm3431_vm2, %v3430_v4 }
 0x107   : > { %3237 = vmatmul.mubr.msk.f32.vlgmr.msra.gmra.mxu1 %vm425_vm3, %v408_v54  ;;  %3279 = vmatprep.subr.mxu0 %v3430_v4 }
 0x108   : > { %3245 = vmatpush3.msk.msra.mxu1 %vm428_vm1, %v3557_v20  ;;  %3246 = vmatprep.mubr.msk.f32.mxu1 %vm3431_vm2, %v3430_v4 }
 0x109   : > { %3272 = vmatmul.mubr.msk.f32.vlgmr.msra.gmra.mxu0 %vm425_vm3, %v406_v46  ;;  %3254 = vmatprep.subr.mxu1 %v3430_v4 }
 0x10a   : > { %3280 = vmatpush3.msk.msra.mxu0 %vm428_vm1, %v3599_v27  ;;  %3281 = vmatprep.mubr.msk.f32.mxu0 %vm3431_vm2, %v3430_v4 }
 0x10b   : > { %3247 = vmatmul.mubr.msk.f32.vlgmr.msra.gmra.mxu1 %vm425_vm3, %v397_v47  ;;  %3289 = vmatprep.subr.mxu0 %v3430_v4 }
 0x10c   : > { %3255 = vmatpush3.msk.msra.mxu1 %vm428_vm1, %v3615_v29  ;;  %3256 = vmatprep.mubr.msk.f32.mxu1 %vm3431_vm2, %v3430_v4 }
 0x10d   : > { %3282 = vmatmul.mubr.msk.f32.vlgmr.msra.gmra.mxu0 %vm425_vm3, %v3552_v19  ;;  %3264 = vmatprep.subr.mxu1 %v3430_v4 }
 0x10e   : > { %3290 = vmatpush3.msk.msra.mxu0 %vm428_vm1, %v3628_v32  ;;  %3291 = vmatprep.mubr.msk.f32.mxu0 %vm3431_vm2, %v3430_v4 }
 0x10f   : > { %3257 = vmatmul.mubr.msk.f32.vlgmr.msra.gmra.mxu1 %vm425_vm3, %v407_v50  ;;  %3299 = vmatprep.subr.mxu0 %v3430_v4 }
 0x110   : > { %3265 = vmatpush3.msk.msra.mxu1 %vm428_vm1, %v3643_v35  ;;  %3266 = vmatprep.mubr.msk.f32.mxu1 %vm3431_vm2, %v3430_v4 }
 0x111   : > { %3292 = vmatmul.mubr.msk.f32.vlgmr.msra.gmra.mxu0 %vm425_vm3, %v3607_v28  ;;  %3274 = vmatprep.subr.mxu1 %v3430_v4 }
 0x112   : > { %3300 = vmatpush3.msk.msra.mxu0 %vm428_vm1, %v3656_v38  ;;  %3301 = vmatprep.mubr.msk.f32.mxu0 %vm3431_vm2, %v3430_v4 }
 0x113   : > { %3267 = vmatmul.mubr.msk.f32.vlgmr.msra.gmra.mxu1 %vm425_vm3, %v404_v52  ;;  %3309 = vmatprep.subr.mxu0 %v3430_v4 }
 0x114   : > { %3275 = vmatpush3.msk.msra.mxu1 %vm428_vm1, %v3670_v40  ;;  %3276 = vmatprep.mubr.msk.f32.mxu1 %vm3431_vm2, %v3430_v4 }
 0x115   : > { %3302 = vmatmul.mubr.msk.f32.vlgmr.msra.gmra.mxu0 %vm425_vm3, %v3560_v21  ;;  %3284 = vmatprep.subr.mxu1 %v3430_v4 }
 0x116   : > { %3310 = vmatpush3.msk.msra.mxu0 %vm428_vm1, %v3683_v42  ;;  %3311 = vmatprep.mubr.msk.f32.mxu0 %vm3431_vm2, %v3430_v4 }
 0x117   : > { %3277 = vmatmul.mubr.msk.f32.vlgmr.msra.gmra.mxu1 %vm425_vm3, %v408_v54  ;;  %3319 = vmatprep.subr.mxu0 %v3430_v4 }
 0x118   : > { %3285 = vmatpush3.msk.msra.mxu1 %vm428_vm1, %v3698_v45  ;;  %3286 = vmatprep.mubr.msk.f32.mxu1 %vm3431_vm2, %v3430_v4 }
 0x119   : > { %3312 = vmatmul.mubr.msk.f32.vlgmr.msra.gmra.mxu0 %vm425_vm3, %v3591_v26  ;;  %3294 = vmatprep.subr.mxu1 %v3430_v4 }
 0x11a   : > { %3323 = vmatprep.mubr.msk.f32.mxu0 %vm3431_vm2, %v3430_v4  ;;  %3320 = vmatpush3.xpose.msk.msra.mxu0 %vm227_vm0, %v2813_v55 }
 0x11b   : > { %3287 = vmatmul.mubr.msk.f32.vlgmr.msra.gmra.mxu1 %vm425_vm3, %v3574_v23  ;;  %3321 = vmatprep.subr.mxu0 %v3430_v4 }
 0x11c   : > { %3295 = vmatpush3.msk.msra.mxu1 %vm428_vm1, %v3717_v48  ;;  %3296 = vmatprep.mubr.msk.f32.mxu1 %vm3431_vm2, %v3430_v4 }
 0x11d   : > { %3304 = vmatprep.subr.mxu1 %v3430_v4 }
 0x11e   : > { %3322 = vmatpush3.xpose.msk.msra.mxu0 %vm227_vm0, %v2812_v56 }
 0x11f   : > { %3297 = vmatmul.mubr.msk.f32.vlgmr.msra.gmra.mxu1 %vm425_vm3, %v3636_v34 }
 0x120   : > { %3305 = vmatpush3.msk.msra.mxu1 %vm428_vm1, %v3734_v51  ;;  %3306 = vmatprep.mubr.msk.f32.mxu1 %vm3431_vm2, %v3430_v4 }
 0x121   : > { %3314 = vmatprep.subr.mxu1 %v3430_v4 }
 0x123   : > { %3307 = vmatmul.mubr.msk.f32.vlgmr.msra.gmra.mxu1 %vm425_vm3, %v3663_v39 }
 0x124   : > { %3315 = vmatpush3.msk.msra.mxu1 %vm428_vm1, %v424_v53  ;;  %3316 = vmatprep.mubr.msk.f32.mxu1 %vm3431_vm2, %v3430_v4 }
 0x127   : > { %3317 = vmatmul.mubr.msk.f32.vlgmr.msra.gmra.mxu1 %vm425_vm3, %v3693_v44 }
 0x1a3   : > { %v498_v57 = vpop.f32.mrf.mxu1 }
 0x1a5   : > { %v3163_v58 = vpop.f32.mrf.mxu1  ;;  %v798_v59 = vpop.f32.mrf.mxu0 }
 0x1a7   : > { %v573_v60 = vpop.f32.mrf.mxu1  ;;  %v3183_v61 = vpop.f32.mrf.mxu0 }
 0x1a9   : > { %v3168_v62 = vpop.f32.mrf.mxu1  ;;  %v948_v63 = vpop.f32.mrf.mxu0 }
 0x1ab   : > { %v648_v0 = vpop.f32.mrf.mxu1  ;;  %v3193_v1 = vpop.f32.mrf.mxu0 }
 0x1ad   : > { %v3173_v2 = vpop.f32.mrf.mxu1  ;;  %v1098_v3 = vpop.f32.mrf.mxu0 }
 0x1ae   : > { %v1627_v22 = vsub.f32 %v498_v57, %v1098_v3 }
 0x1af   : > { %v723_v5 = vpop.f32.mrf.mxu1  ;;  %v3203_v6 = vpop.f32.mrf.mxu0 }
 0x1b1   : > { %v3178_v4 = vpop.f32.mrf.mxu1  ;;  %v1248_v7 = vpop.f32.mrf.mxu0 }
 0x1b2   : > { %v1629_v19 = vsub.f32 %v648_v0, %v1248_v7 }
 0x1b3   : > { %v873_v8 = vpop.f32.mrf.mxu1  ;;  %v3213_v9 = vpop.f32.mrf.mxu0 }
 0x1b4   : > { %v2766_v28 = vrot.slane %v1629_v19, 6 }
 0x1b5   : > { %v3188_v10 = vpop.f32.mrf.mxu1  ;;  %v1398_v11 = vpop.f32.mrf.mxu0 }
 0x1b6   : > { %v1631_v29 = vsub.f32 %v798_v59, %v1398_v11 }
 0x1b7   : > { %v1023_v12 = vpop.f32.mrf.mxu1  ;;  %v3223_v13 = vpop.f32.mrf.mxu0 }
 0x1b8   : > { %v2772_v38 = vrot.slane %v1631_v29, 4 }
 0x1b9   : > { %v3198_v14 = vpop.f32.mrf.mxu1  ;;  %v1548_v15 = vpop.f32.mrf.mxu0 }
 0x1ba   : > { %v1633_v39 = vsub.f32 %v948_v63, %v1548_v15 }
 0x1bb   : > { %v1173_v16 = vpop.f32.mrf.mxu1  ;;  %v3233_v17 = vpop.f32.mrf.mxu0 }
 0x1bc   : > { %v1628_v18 = vsub.f32 %v573_v60, %v1173_v16  ;;  %v2778_v48 = vrot.slane %v1633_v39, 2 }
 0x1bd   : > { %v3208_v20 = vpop.f32.mrf.mxu1  ;;  %v3859_v21 = vpop.f32.mrf.mxu0 }
 0x1be   : > { %v2763_v23 = vrot.slane %v1628_v18, 7 }
 0x1bf   : > { %v1323_v24 = vpop.f32.mrf.mxu1  ;;  %v3243_v25 = vpop.f32.mrf.mxu0 }
 0x1c0   : > { %v2765_v26 = vsel %vm2764_vm4, %v2763_v23, %v1627_v22  ;;  %v1630_v27 = vsub.f32 %v723_v5, %v1323_v24 }
 0x1c1   : > { %v3218_v30 = vpop.f32.mrf.mxu1  ;;  %v1841_v31 = vpop.f32.mrf.mxu0  ;;  %v2768_v33 = vsel %vm2767_vm5, %v2766_v28, %v2765_v26 }
 0x1c2   : > { %v2769_v32 = vrot.slane %v1630_v27, 5 }
 0x1c3   : > { %v1473_v34 = vpop.f32.mrf.mxu1  ;;  %v3253_v35 = vpop.f32.mrf.mxu0 }
 0x1c4   : > { %v2771_v36 = vsel %vm2770_vm6, %v2769_v32, %v2768_v33  ;;  %v1632_v37 = vsub.f32 %v873_v8, %v1473_v34 }
 0x1c5   : > { %v3228_v40 = vpop.f32.mrf.mxu1  ;;  %v1981_v41 = vpop.f32.mrf.mxu0  ;;  %v2774_v43 = vsel %vm2773_vm7, %v2772_v38, %v2771_v36 }
 0x1c6   : > { %v2775_v42 = vrot.slane %v1632_v37, 3 }
 0x1c7   : > { %v1623_v44 = vpop.f32.mrf.mxu1  ;;  %v3263_v45 = vpop.f32.mrf.mxu0 }
 0x1c8   : > { %v2777_v46 = vsel %vm2776_vm8, %v2775_v42, %v2774_v43  ;;  %v1634_v47 = vsub.f32 %v1023_v12, %v1623_v44 }
 0x1c9   : > { %v3238_v49 = vpop.f32.mrf.mxu1  ;;  %v2121_v50 = vpop.f32.mrf.mxu0  ;;  %v2780_v52 = vsel %vm2779_vm9, %v2778_v48, %v2777_v46 }
 0x1ca   : > { %v2781_v51 = vrot.slane %v1634_v47, 1 }
 0x1cb   : > { %v1771_v53 = vpop.f32.mrf.mxu1  ;;  %v3273_v54 = vpop.f32.mrf.mxu0 }
 0x1cc   : > { %v2783_v55 = vsel %vm2782_vm10, %v2781_v51, %v2780_v52 }
 0x1cd   : > { %2785 = vst.msk [vmem:[#allocation2] sm:$0xff] %vm425_vm3, %v2783_v55  ;;  %v3248_v56 = vpop.f32.mrf.mxu1  ;;  %v2261_v57 = vpop.f32.mrf.mxu0 }
 0x1ce   : > { %v2262_v12 = vadd.f32 %v2261_v57, %v3859_v21 }
 0x1cf   : > { %v1911_v58 = vpop.f32.mrf.mxu1  ;;  %v3283_v59 = vpop.f32.mrf.mxu0 }
 0x1d1   : > { %v3258_v60 = vpop.f32.mrf.mxu1  ;;  %v2401_v61 = vpop.f32.mrf.mxu0 }
 0x1d2   : > { %v2402_v10 = vadd.f32 %v2401_v61, %v1841_v31 }
 0x1d3   : > { %v2051_v62 = vpop.f32.mrf.mxu1  ;;  %v3293_v63 = vpop.f32.mrf.mxu0 }
 0x1d4   : > { %v2810_v0 = vld [vmem:[#allocation2] sm:$0xff]  ;;  %v2796_v17 = vrot.slane %v2402_v10, 6 }
 0x1d5   : > { %v2541_v1 = vpop.f32.mrf.mxu0  ;;  %2814 = vxpose.xlu0.b32.start [1/2] (short) (narrow) %v2810_v0, 8  ;;  %v3268_v2 = vpop.f32.mrf.mxu1 }
 0x1d6   : > { %v2542_v18 = vadd.f32 %v2541_v1, %v1981_v41 }
 0x1d7   : > { %v2191_v3 = vpop.f32.mrf.mxu1  ;;  %v3303_v5 = vpop.f32.mrf.mxu0 }
 0x1d8   : > { %v2800_v26 = vrot.slane %v2542_v18, 4 }
 0x1d9   : > { %v3278_v6 = vpop.f32.mrf.mxu1  ;;  %v2681_v4 = vpop.f32.mrf.mxu0 }
 0x1da   : > { %v2682_v27 = vadd.f32 %v2681_v4, %v2121_v50 }
 0x1db   : > { %v2331_v7 = vpop.f32.mrf.mxu1  ;;  %v3313_v8 = vpop.f32.mrf.mxu0 }
 0x1dc   : > { %v2332_v9 = vadd.f32 %v2331_v7, %v1771_v53  ;;  %v2804_v33 = vrot.slane %v2682_v27, 2 }
 0x1dd   : > { %v3288_v11 = vpop.f32.mrf.mxu1 }
 0x1de   : > { %v2794_v13 = vrot.slane %v2332_v9, 7 }
 0x1df   : > { %v2471_v14 = vpop.f32.mrf.mxu1 }
 0x1e0   : > { %v2795_v15 = vsel %vm2764_vm4, %v2794_v13, %v2262_v12  ;;  %v2472_v16 = vadd.f32 %v2471_v14, %v1911_v58 }
 0x1e1   : > { %v3298_v19 = vpop.f32.mrf.mxu1  ;;  %v2797_v22 = vsel %vm2767_vm5, %v2796_v17, %v2795_v15 }
 0x1e2   : > { %v2798_v20 = vrot.slane %v2472_v16, 5 }
 0x1e3   : > { %v2611_v23 = vpop.f32.mrf.mxu1 }
 0x1e4   : > { %v2799_v24 = vsel %vm2770_vm6, %v2798_v20, %v2797_v22  ;;  %v2612_v25 = vadd.f32 %v2611_v23, %v2051_v62 }
 0x1e5   : > { %v3308_v28 = vpop.f32.mrf.mxu1  ;;  %v2801_v29 = vsel %vm2773_vm7, %v2800_v26, %v2799_v24 }
 0x1e6   : > { %v2802_v21 = vrot.slane %v2612_v25, 3 }
 0x1e7   : > { %v2751_v30 = vpop.f32.mrf.mxu1 }
 0x1e8   : > { %v2803_v31 = vsel %vm2776_vm8, %v2802_v21, %v2801_v29  ;;  %v2752_v32 = vadd.f32 %v2751_v30, %v2191_v3 }
 0x1e9   : > { %v3318_v34 = vpop.f32.mrf.mxu1  ;;  %v2805_v36 = vsel %vm2779_vm9, %v2804_v33, %v2803_v31 }
 0x1ea   : > { %v2806_v35 = vrot.slane %v2752_v32, 1 }
 0x1ec   : > { %v2807_v37 = vsel %vm2782_vm10, %v2806_v35, %v2805_v36 }
 0x1ed   : > { %2809 = vst.msk [vmem:[#allocation2 + $0x8] sm:$0xff] %vm425_vm3, %v2807_v37 }
 0x1f4   : > { %v2811_v38 = vld [vmem:[#allocation2 + $0x8] sm:$0xff] }
 0x1f5   : > { %2815 = vxpose.xlu0.b32.end [2/2] (short) (narrow) %v2811_v38, 8 }
 0x26d   : > { %v2830_v39 = vpop.trf.xlu0 }
 0x26e   : > { %3324 = vmatmul.mubr.msk.f32.vlgmr.msra.gmra.mxu0 %vm227_vm0, %v2830_v39 }
 0x32e   : > { %v2921_v40 = vpop.f32.mrf.mxu0 }
 0x32f   : > { %2926 = vst.msk [vmem:[%s217_s30] sm:$0xf] %vm2925_vm11, %v2921_v40 }
 0x330   : > { %v3325_v41 = vpop.f32.mrf.mxu0 }
 0x331   : > { %3381 = shalt.err (!%p3378_p3)
}
 0x332   : > { %s3382_s14 = scalar_lea.hbm %s3884_s9, 64  ;;  %s3386_s17 = scalar_lea.hbm %s3930_s5, 128 }
 0x333   : > { %p3383_p4 = scmp.ne.s32.totalorder %s3884_s9, %s3382_s14  ;;  %p3387_p9 = scmp.lt.s32.totalorder %s3884_s9, %s3930_s5 }
 0x334   : > { %p3388_p10 = scmp.lt.s32.totalorder %s3386_s17, %s3382_s14 }
 0x335   : > { %p3384_p7 = pnand %p3383_p4, %p3502_p5 }
 0x336   : > { %p3389_p11 = por %p3388_p10, %p3387_p9 }
 0x337   : > { %p3385_p8 = pneg %p3384_p7 }
 0x339   : > { %p3390_p12 = pnand %p3389_p11, %p3385_p8 }
 0x33b   : > { %3393 = shalt.err (!%p3390_p12)
}
 0x33c   : > { %3326 = dma.vmem_to_hbm [thread:$0]  (%p3502_p5), %s3886_s6, 64, %s3884_s9, %s2928_s10  }
 0x33d PF: > { %p3332_p13 = scmp.ge.s32.totalorder %s3428_s21, 2  ;;  %s2953_s26 = sand.u32 1, %s3416_s18  }
 0x33e   : > { %s2954_s30 = scalar_lea.sflag [#allocation4], %s2953_s26 }
 0x33f   : > { %p3329_p0 = pnand %p3332_p13, %p3506_p6 }
 0x341   : > { %p3330_p1 = pneg %p3329_p0 }
 0x343   : > { %3411 = dma.done.wait (%p3330_p1), %s2954_s30, 64  }
 0x344   : > { %3413 = vsyncadd (%p3330_p1), %s2954_s30, 4294967232  ;;  %p15_p2 = scmp.ge.s32.totalorder %s3489_s24, 4   ;;  %s3933_s18 = smov %s3420_s19 }
 0x345   : > { %s3934_s19 = smov %s3424_s20  ;;  %s3935_s20 = smov %s3500_s27 }
 0x346   : > { %s3936_s21 = smov %s3489_s24  ;;  %17 = sbr.rel (!%p15_p2) target bundleno = 3 (0x3), region = 75 }
 0x34b   :  { %2959 = vsyncpa [#allocation4], 1 }
 0x34c   :  { %2961 = vsyncpa [#allocation4 + $0x1], 1 }

// kernel: tpu_custom_call.1
= control target key start
LH: loop header
LB: loop body
LE: loop exit
PB: predicated region body
PF: predicated region fallthrough
CT: control target
= control target key end

     0   :  { %10 = vsyncpa [#allocation4], 0  ;;  %s3925_s0 = inlined_call_operand.vmem [shape: f32[2,16,4], index: 0, kind: input, shape index: {}]   ;;  %s3926_s1 = inlined_call_operand.vmem [shape: f32[16,16], index: 1, kind: input, shape index: {}]   ;;  %s3927_s2 = inlined_call_operand.vmem [shape: f32[8,4,4], index: 2, kind: input, shape index: {}]   ;;  %s3928_s3 = inlined_call_operand.vmem [shape: f32[8,4,4], index: 3, kind: input, shape index: {}]   ;;  %s3929_s4 = inlined_call_operand.vmem [shape: f32[16,16], index: 4, kind: input, shape index: {}]   ;;  %s3930_s5 = inlined_call_operand.hbm [shape: f32[2,4,16], index: 5, kind: output, shape index: {}]  }
   0x1   :  { %12 = vsyncpa [#allocation4 + $0x1], 0  ;;  %s3464_s18 = smov 0   ;;  %s3466_s19 = smov 0  }
   0x2   :  { %s3468_s20 = smov 0   ;;  %s3470_s21 = smov 0  }
   0x3 LB: > { %s3485_s22 = sadd.s32 4294967295, %s3428_s21   ;;  %s3000_s23 = sadd.s32 4294967294, %s3428_s21   ;;  %s3428_s21 = sphi %s3470_s21, %s3936_s21   ;;  %s3424_s20 = sphi %s3468_s20, %s3935_s20   ;;  %s3420_s19 = sphi %s3466_s19, %s3934_s19   ;;  %s3416_s18 = sphi %s3464_s18, %s3933_s18  }
   0x4   : > { %s3489_s24 = sadd.s32 1, %s3428_s21   ;;  %s135_s25 = sadd.s32 1, %s3424_s20 }
   0x5   : > { %s132_s26 = ssub.s32 %s3428_s21, %s3489_s24  ;;  %p145_p0 = scmp.ne.s32.totalorder %s3424_s20, %s3420_s19 }
   0x6   : > { %p133_p1 = scmp.eq.s32.totalorder %s132_s26, 0  ;;  %p146_p2 = scmp.eq.s32.totalorder %s3485_s22, 1 }
   0x7   : > { %p151_p3 = scmp.ne.s32.totalorder %s3420_s19, %s3416_s18  ;;  %p152_p4 = scmp.eq.s32.totalorder %s3000_s23, 1 }
   0x8   : > { %s3500_s27 = scalar_select %p133_p1, %s3424_s20, %s135_s25  }
   0x9   : > { %p3502_p5 = por %p146_p2, %p145_p0  ;;  %p3506_p6 = por %p152_p4, %p151_p3 }
   0xa   : > { %p3003_p7 = scmp.ge.s32.totalorder %s3428_s21, 1  ;;  %p190_p8 = scmp.lt.s32.totalorder %s3428_s21, 3 }
   0xc   : > { %p191_p9 = pnand %p3003_p7, %p190_p8 }
   0xd   : > { %p218_p10 = scmp.lt.s32.totalorder (!%p191_p9), %s3485_s22, 1  ;;  %s215_s23 = sand.u32 (!%p191_p9), 1, %s3420_s19  }
   0xe   : > { %194 = sbr.rel (%p191_p9) target bundleno = 829 (0x33d), region = 40  ;;  %s3004_s25 = sshll.u32 (!%p191_p9), %s215_s23, 2 }
   0xf   : > { %s3077_s26 = sshll.u32 (!%p191_p9), %s3485_s22, 6  ;;  %s217_s30 = scalar_lea.vmem (!%p191_p9), [#allocation3], %s3004_s25 }
  0x10   : > { %s2941_s6 = sshll.u32 (!%p191_p9), %s217_s30, 4  ;;  %s3884_s9 = scalar_lea.hbm (!%p191_p9), %s3930_s5, %s3077_s26  ;;  %s3886_s6 = int_to_ptr.vmem [resolvable:$true] %s2941_s6 }
  0x11   : > { %s2928_s10 = scalar_lea.sflag (!%p191_p9), [#allocation4], %s215_s23 }
  0x13   : > { %v223_v0 = vld [vmem:[%s3926_s1] sm:$0xff]  ;;  %vm227_vm0 = vcmask 130048   ;;  %s219_s7 = scalar_select %p218_p10, %s3485_s22, 1  ;;  %v224_v3 = vld [vmem:[%s3926_s1 + $0x8] sm:$0xff]  ;;  %v3430_v4 = vmov 0.0   ;;  %vm428_vm1 = vcmask 1043456   ;;  %v314_v9 = vlaneseq }
  0x14   : > { %3156 = vmatprep.mubr.msk.f32.mxu0 %vm227_vm0, %v223_v0  ;;  %3159 = vmatprep.subr.mxu1 %v3430_v4  ;;  %v3529_v5 = vld [vmem:[%s3927_s2] sm:$0xf]  ;;  %vm3431_vm2 = vmmov 0   ;;  %v3540_v6 = vld [vmem:[%s3927_s2 + $0x10] sm:$0xf]  ;;  %vm425_vm3 = vcmask 31744  }
  0x15   : > { %s3080_s8 = sshll.u32 %s219_s7, 4  ;;  %3160 = vmatpush3.msk.msra.mxu1 %vm428_vm1, %v3529_v5  ;;  %3161 = vmatprep.mubr.msk.f32.mxu1 %vm3431_vm2, %v3430_v4  ;;  %v3432_v7 = vmov 1966171168   ;;  %v315_v11 = vshrl.u32 %v314_v9, 7  ;;  %v3557_v20 = vld [vmem:[%s3927_s2 + $0x4] sm:$0xf] }
  0x16   : > { %s222_s11 = scalar_lea.vmem %s3925_s0, %s3080_s8  ;;  %3164 = vmatprep.subr.mxu1 %v3430_v4  ;;  %v312_v8 = vunpack.c.l.s4 %v3432_v7  ;;  %v3567_v22 = vld [vmem:[%s3927_s2 + $0x18] sm:$0xf]  ;;  %v3582_v24 = vld [vmem:[%s3927_s2 + $0x8] sm:$0xf]  ;;  %v3599_v27 = vld [vmem:[%s3928_s3] sm:$0xf] }
  0x17   : > { %v226_v1 = vld [vmem:[%s222_s11 + $0x8] sm:$0xff]  ;;  %v225_v2 = vld [vmem:[%s222_s11] sm:$0xff]  ;;  %v3643_v35 = vld [vmem:[%s3927_s2 + $0x14] sm:$0xf]  ;;  %vm2764_vm4 = vcmask 1041409   ;;  %vm2767_vm5 = vcmask 1042434  }
  0x18   : > { %3152 = vmatprep.subr.mxu0 %v226_v1  ;;  %v313_v10 = vunpack.c.0.s8 %v312_v8  ;;  %v3615_v29 = vld [vmem:[%s3927_s2 + $0xc] sm:$0xf]  ;;  %v3628_v32 = vld [vmem:[%s3928_s3 + $0x8] sm:$0xf]  ;;  %v3656_v38 = vld [vmem:[%s3928_s3 + $0x10] sm:$0xf] }
  0x19   : > { %3153 = vmatpush3.msra.mxu0 %v226_v1  ;;  %v3670_v40 = vld [vmem:[%s3927_s2 + $0x1c] sm:$0xf]  ;;  %v3683_v42 = vld [vmem:[%s3928_s3 + $0x18] sm:$0xf]  ;;  %v3698_v45 = vld [vmem:[%s3928_s3 + $0x4] sm:$0xf] }
  0x1a   : > { %3154 = vmatprep.subr.mxu0 %v225_v2  ;;  %v3547_v13 = vsub.s32 %v313_v10, %v315_v11  ;;  %v3717_v48 = vld [vmem:[%s3928_s3 + $0xc] sm:$0xf]  ;;  %v3734_v51 = vld [vmem:[%s3928_s3 + $0x14] sm:$0xf]  ;;  %v424_v53 = vld [vmem:[%s3928_s3 + $0x1c] sm:$0xf] }
  0x1b   : > { %3155 = vmatpush3.msra.mxu0 %v225_v2  ;;  %v2813_v55 = vld [vmem:[%s3929_s4 + $0x8] sm:$0xff]  ;;  %v2812_v56 = vld [vmem:[%s3929_s4] sm:$0xff]  ;;  %vm2770_vm6 = vcmask 1043459   ;;  %vm2773_vm7 = vcmask 1044484   ;;  %vm2776_vm8 = vcmask 1045509   ;;  %vm2779_vm9 = vcmask 1046534  }
  0x1c   : > { %3157 = vmatmul.mubr.msk.f32.vlgmr.msra.gmra.mxu0 %vm227_vm0, %v224_v3  ;;  %3179 = vmatprep.subr.mxu0 %v3430_v4  ;;  %vm2782_vm10 = vcmask 1047559   ;;  %vm2925_vm11 = vcmask 125952   ;;  %s3368_s11 = scalar_lea.vmem %s3886_s6, 64  ;;  %s3433_s22 = smov [#allocation3]  }
  0x1d   : > { %3181 = vmatprep.mubr.msk.f32.mxu0 %vm3431_vm2, %v3430_v4  ;;  %3180 = vmatpush3.msk.msra.mxu0 %vm428_vm1, %v3540_v6  ;;  %p3369_p11 = scmp.ne.s32.totalorder %s3886_s6, %s3368_s11  ;;  %s3372_s12 = sshll.u32 %s3433_s22, 4  ;;  %s3373_s12 = int_to_ptr.vmem [resolvable:$false] %s3372_s12 }
  0x1e   : > { %3189 = vmatprep.subr.mxu0 %v3430_v4  ;;  %s3374_s13 = scalar_lea.vmem %s3373_s12, 128  ;;  %p3375_p0 = scmp.lt.s32.totalorder %s3886_s6, %s3373_s12 }
  0x1f   : > { %p3370_p12 = pnand %p3369_p11, %p3502_p5  ;;  %p3376_p1 = scmp.lt.s32.totalorder %s3374_s13, %s3368_s11 }
  0x21   : > { %p3371_p13 = pneg %p3370_p12  ;;  %p3377_p2 = por %p3376_p1, %p3375_p0 }
  0x23   : > { %p3378_p3 = pnand %p3377_p2, %p3371_p13 }
  0xdc   : > { %v3158_v12 = vpop.f32.mrf.mxu0 }
  0xdd   : > { %v367_v25 = vrot.slane %v3158_v12, %v3547_v13  ;;  %v360_v30 = vcombine.high %v3158_v12, %v3158_v12 }
  0xde   : > { %v300_v14 = vpop.f32.mrf.mxu0 }
  0xdf   : > { %v310_v15 = vcombine.high %v300_v14, %v300_v14  ;;  %v317_v16 = vrot.slane %v300_v14, %v3547_v13  ;;  %v383_v31 = vrot.slane %v367_v25, %v3547_v13  ;;  %v374_v36 = vrot.slane %v360_v30, %v3547_v13 }
  0xe0   : > { %v375_v43 = vcombine.high %v367_v25, %v367_v25 }
  0xe1   : > { %v324_v17 = vrot.slane %v310_v15, %v3547_v13  ;;  %v325_v18 = vcombine.high %v317_v16, %v317_v16  ;;  %v3552_v19 = vrot.slane %v317_v16, %v3547_v13  ;;  %v405_v37 = vcombine.high %v383_v31, %v383_v31 }
  0xe2   : > { %v390_v41 = vrot.slane %v374_v36, %v3547_v13  ;;  %v397_v47 = vrot.slane %v375_v43, %v3547_v13  ;;  %v376_v49 = vcombine.high %v374_v36, %v374_v36 }
  0xe3   : > { %v3560_v21 = vrot.slane %v324_v17, %v3547_v13  ;;  %3162 = vmatmul.mubr.msk.f32.vlgmr.msra.gmra.mxu1 %vm425_vm3, %v3552_v19  ;;  %v3574_v23 = vrot.slane %v325_v18, %v3547_v13  ;;  %v3607_v28 = vcombine.high %v3552_v19, %v3552_v19  ;;  %v326_v33 = vcombine.high %v324_v17, %v324_v17 }
  0xe4   : > { %3165 = vmatpush3.msk.msra.mxu1 %vm428_vm1, %v3557_v20  ;;  %3166 = vmatprep.mubr.msk.f32.mxu1 %vm3431_vm2, %v3430_v4  ;;  %v406_v46 = vcombine.high %v390_v41, %v390_v41  ;;  %v407_v50 = vcombine.high %v397_v47, %v397_v47  ;;  %v404_v52 = vrot.slane %v376_v49, %v3547_v13 }
  0xe5   : > { %3182 = vmatmul.mubr.msk.f32.vlgmr.msra.gmra.mxu0 %vm425_vm3, %v3560_v21  ;;  %3169 = vmatprep.subr.mxu1 %v3430_v4  ;;  %v3591_v26 = vcombine.high %v3560_v21, %v3560_v21  ;;  %v3636_v34 = vcombine.high %v3574_v23, %v3574_v23  ;;  %v3663_v39 = vrot.slane %v326_v33, %v3547_v13 }
  0xe6   : > { %3190 = vmatpush3.msk.msra.mxu0 %vm428_vm1, %v3567_v22  ;;  %3191 = vmatprep.mubr.msk.f32.mxu0 %vm3431_vm2, %v3430_v4  ;;  %v408_v54 = vcombine.high %v404_v52, %v404_v52 }
  0xe7   : > { %3167 = vmatmul.mubr.msk.f32.vlgmr.msra.gmra.mxu1 %vm425_vm3, %v3574_v23  ;;  %3199 = vmatprep.subr.mxu0 %v3430_v4  ;;  %v3693_v44 = vcombine.high %v3663_v39, %v3663_v39 }
  0xe8   : > { %3170 = vmatpush3.msk.msra.mxu1 %vm428_vm1, %v3582_v24  ;;  %3171 = vmatprep.mubr.msk.f32.mxu1 %vm3431_vm2, %v3430_v4 }
  0xe9   : > { %3192 = vmatmul.mubr.msk.f32.vlgmr.msra.gmra.mxu0 %vm425_vm3, %v3591_v26  ;;  %3174 = vmatprep.subr.mxu1 %v3430_v4 }
  0xea   : > { %3200 = vmatpush3.msk.msra.mxu0 %vm428_vm1, %v3599_v27  ;;  %3201 = vmatprep.mubr.msk.f32.mxu0 %vm3431_vm2, %v3430_v4 }
  0xeb   : > { %3172 = vmatmul.mubr.msk.f32.vlgmr.msra.gmra.mxu1 %vm425_vm3, %v3607_v28  ;;  %3209 = vmatprep.subr.mxu0 %v3430_v4 }
  0xec   : > { %3175 = vmatpush3.msk.msra.mxu1 %vm428_vm1, %v3615_v29  ;;  %3176 = vmatprep.mubr.msk.f32.mxu1 %vm3431_vm2, %v3430_v4 }
  0xed   : > { %3202 = vmatmul.mubr.msk.f32.vlgmr.msra.gmra.mxu0 %vm425_vm3, %v383_v31  ;;  %3184 = vmatprep.subr.mxu1 %v3430_v4 }
  0xee   : > { %3210 = vmatpush3.msk.msra.mxu0 %vm428_vm1, %v3628_v32  ;;  %3211 = vmatprep.mubr.msk.f32.mxu0 %vm3431_vm2, %v3430_v4 }
  0xef   : > { %3177 = vmatmul.mubr.msk.f32.vlgmr.msra.gmra.mxu1 %vm425_vm3, %v3636_v34  ;;  %3219 = vmatprep.subr.mxu0 %v3430_v4 }
  0xf0   : > { %3185 = vmatpush3.msk.msra.mxu1 %vm428_vm1, %v3643_v35  ;;  %3186 = vmatprep.mubr.msk.f32.mxu1 %vm3431_vm2, %v3430_v4 }
  0xf1   : > { %3212 = vmatmul.mubr.msk.f32.vlgmr.msra.gmra.mxu0 %vm425_vm3, %v405_v37  ;;  %3194 = vmatprep.subr.mxu1 %v3430_v4 }
  0xf2   : > { %3220 = vmatpush3.msk.msra.mxu0 %vm428_vm1, %v3656_v38  ;;  %3221 = vmatprep.mubr.msk.f32.mxu0 %vm3431_vm2, %v3430_v4 }
  0xf3   : > { %3187 = vmatmul.mubr.msk.f32.vlgmr.msra.gmra.mxu1 %vm425_vm3, %v3663_v39  ;;  %3229 = vmatprep.subr.mxu0 %v3430_v4 }
  0xf4   : > { %3195 = vmatpush3.msk.msra.mxu1 %vm428_vm1, %v3670_v40  ;;  %3196 = vmatprep.mubr.msk.f32.mxu1 %vm3431_vm2, %v3430_v4 }
  0xf5   : > { %3222 = vmatmul.mubr.msk.f32.vlgmr.msra.gmra.mxu0 %vm425_vm3, %v390_v41  ;;  %3204 = vmatprep.subr.mxu1 %v3430_v4 }
  0xf6   : > { %3230 = vmatpush3.msk.msra.mxu0 %vm428_vm1, %v3683_v42  ;;  %3231 = vmatprep.mubr.msk.f32.mxu0 %vm3431_vm2, %v3430_v4 }
  0xf7   : > { %3197 = vmatmul.mubr.msk.f32.vlgmr.msra.gmra.mxu1 %vm425_vm3, %v3693_v44  ;;  %3239 = vmatprep.subr.mxu0 %v3430_v4 }
  0xf8   : > { %3205 = vmatpush3.msk.msra.mxu1 %vm428_vm1, %v3698_v45  ;;  %3206 = vmatprep.mubr.msk.f32.mxu1 %vm3431_vm2, %v3430_v4 }
  0xf9   : > { %3232 = vmatmul.mubr.msk.f32.vlgmr.msra.gmra.mxu0 %vm425_vm3, %v406_v46  ;;  %3214 = vmatprep.subr.mxu1 %v3430_v4 }
  0xfa   : > { %3240 = vmatpush3.msk.msra.mxu0 %vm428_vm1, %v3529_v5  ;;  %3241 = vmatprep.mubr.msk.f32.mxu0 %vm3431_vm2, %v3430_v4 }
  0xfb   : > { %3207 = vmatmul.mubr.msk.f32.vlgmr.msra.gmra.mxu1 %vm425_vm3, %v397_v47  ;;  %3249 = vmatprep.subr.mxu0 %v3430_v4 }
  0xfc   : > { %3215 = vmatpush3.msk.msra.mxu1 %vm428_vm1, %v3717_v48  ;;  %3216 = vmatprep.mubr.msk.f32.mxu1 %vm3431_vm2, %v3430_v4 }
  0xfd   : > { %3242 = vmatmul.mubr.msk.f32.vlgmr.msra.gmra.mxu0 %vm425_vm3, %v383_v31  ;;  %3224 = vmatprep.subr.mxu1 %v3430_v4 }
  0xfe   : > { %3250 = vmatpush3.msk.msra.mxu0 %vm428_vm1, %v3582_v24  ;;  %3251 = vmatprep.mubr.msk.f32.mxu0 %vm3431_vm2, %v3430_v4 }
  0xff   : > { %3217 = vmatmul.mubr.msk.f32.vlgmr.msra.gmra.mxu1 %vm425_vm3, %v407_v50  ;;  %3259 = vmatprep.subr.mxu0 %v3430_v4 }
 0x100   : > { %3225 = vmatpush3.msk.msra.mxu1 %vm428_vm1, %v3734_v51  ;;  %3226 = vmatprep.mubr.msk.f32.mxu1 %vm3431_vm2, %v3430_v4 }
 0x101   : > { %3252 = vmatmul.mubr.msk.f32.vlgmr.msra.gmra.mxu0 %vm425_vm3, %v405_v37  ;;  %3234 = vmatprep.subr.mxu1 %v3430_v4 }
 0x102   : > { %3260 = vmatpush3.msk.msra.mxu0 %vm428_vm1, %v3540_v6  ;;  %3261 = vmatprep.mubr.msk.f32.mxu0 %vm3431_vm2, %v3430_v4 }
 0x103   : > { %3227 = vmatmul.mubr.msk.f32.vlgmr.msra.gmra.mxu1 %vm425_vm3, %v404_v52  ;;  %3269 = vmatprep.subr.mxu0 %v3430_v4 }
 0x104   : > { %3235 = vmatpush3.msk.msra.mxu1 %vm428_vm1, %v424_v53  ;;  %3236 = vmatprep.mubr.msk.f32.mxu1 %vm3431_vm2, %v3430_v4 }
 0x105   : > { %3262 = vmatmul.mubr.msk.f32.vlgmr.msra.gmra.mxu0 %vm425_vm3, %v390_v41  ;;  %3244 = vmatprep.subr.mxu1 %v3430_v4 }
 0x106   : > { %3270 = vmatpush3.msk.msra.mxu0 %vm428_vm1, %v3567_v22  ;;  %3271 = vmatprep.mubr.msk.f32.mxu0 %vm3431_vm2, %v3430_v4 }
 0x107   : > { %3237 = vmatmul.mubr.msk.f32.vlgmr.msra.gmra.mxu1 %vm425_vm3, %v408_v54  ;;  %3279 = vmatprep.subr.mxu0 %v3430_v4 }
 0x108   : > { %3245 = vmatpush3.msk.msra.mxu1 %vm428_vm1, %v3557_v20  ;;  %3246 = vmatprep.mubr.msk.f32.mxu1 %vm3431_vm2, %v3430_v4 }
 0x109   : > { %3272 = vmatmul.mubr.msk.f32.vlgmr.msra.gmra.mxu0 %vm425_vm3, %v406_v46  ;;  %3254 = vmatprep.subr.mxu1 %v3430_v4 }
 0x10a   : > { %3280 = vmatpush3.msk.msra.mxu0 %vm428_vm1, %v3599_v27  ;;  %3281 = vmatprep.mubr.msk.f32.mxu0 %vm3431_vm2, %v3430_v4 }
 0x10b   : > { %3247 = vmatmul.mubr.msk.f32.vlgmr.msra.gmra.mxu1 %vm425_vm3, %v397_v47  ;;  %3289 = vmatprep.subr.mxu0 %v3430_v4 }
 0x10c   : > { %3255 = vmatpush3.msk.msra.mxu1 %vm428_vm1, %v3615_v29  ;;  %3256 = vmatprep.mubr.msk.f32.mxu1 %vm3431_vm2, %v3430_v4 }
 0x10d   : > { %3282 = vmatmul.mubr.msk.f32.vlgmr.msra.gmra.mxu0 %vm425_vm3, %v3552_v19  ;;  %3264 = vmatprep.subr.mxu1 %v3430_v4 }
 0x10e   : > { %3290 = vmatpush3.msk.msra.mxu0 %vm428_vm1, %v3628_v32  ;;  %3291 = vmatprep.mubr.msk.f32.mxu0 %vm3431_vm2, %v3430_v4 }
 0x10f   : > { %3257 = vmatmul.mubr.msk.f32.vlgmr.msra.gmra.mxu1 %vm425_vm3, %v407_v50  ;;  %3299 = vmatprep.subr.mxu0 %v3430_v4 }
 0x110   : > { %3265 = vmatpush3.msk.msra.mxu1 %vm428_vm1, %v3643_v35  ;;  %3266 = vmatprep.mubr.msk.f32.mxu1 %vm3431_vm2, %v3430_v4 }
 0x111   : > { %3292 = vmatmul.mubr.msk.f32.vlgmr.msra.gmra.mxu0 %vm425_vm3, %v3607_v28  ;;  %3274 = vmatprep.subr.mxu1 %v3430_v4 }
 0x112   : > { %3300 = vmatpush3.msk.msra.mxu0 %vm428_vm1, %v3656_v38  ;;  %3301 = vmatprep.mubr.msk.f32.mxu0 %vm3431_vm2, %v3430_v4 }
 0x113   : > { %3267 = vmatmul.mubr.msk.f32.vlgmr.msra.gmra.mxu1 %vm425_vm3, %v404_v52  ;;  %3309 = vmatprep.subr.mxu0 %v3430_v4 }
 0x114   : > { %3275 = vmatpush3.msk.msra.mxu1 %vm428_vm1, %v3670_v40  ;;  %3276 = vmatprep.mubr.msk.f32.mxu1 %vm3431_vm2, %v3430_v4 }
 0x115   : > { %3302 = vmatmul.mubr.msk.f32.vlgmr.msra.gmra.mxu0 %vm425_vm3, %v3560_v21  ;;  %3284 = vmatprep.subr.mxu1 %v3430_v4 }
 0x116   : > { %3310 = vmatpush3.msk.msra.mxu0 %vm428_vm1, %v3683_v42  ;;  %3311 = vmatprep.mubr.msk.f32.mxu0 %vm3431_vm2, %v3430_v4 }
 0x117   : > { %3277 = vmatmul.mubr.msk.f32.vlgmr.msra.gmra.mxu1 %vm425_vm3, %v408_v54  ;;  %3319 = vmatprep.subr.mxu0 %v3430_v4 }
 0x118   : > { %3285 = vmatpush3.msk.msra.mxu1 %vm428_vm1, %v3698_v45  ;;  %3286 = vmatprep.mubr.msk.f32.mxu1 %vm3431_vm2, %v3430_v4 }
 0x119   : > { %3312 = vmatmul.mubr.msk.f32.vlgmr.msra.gmra.mxu0 %vm425_vm3, %v3591_v26  ;;  %3294 = vmatprep.subr.mxu1 %v3430_v4 }
 0x11a   : > { %3323 = vmatprep.mubr.msk.f32.mxu0 %vm3431_vm2, %v3430_v4  ;;  %3320 = vmatpush3.xpose.msk.msra.mxu0 %vm227_vm0, %v2813_v55 }
 0x11b   : > { %3287 = vmatmul.mubr.msk.f32.vlgmr.msra.gmra.mxu1 %vm425_vm3, %v3574_v23  ;;  %3321 = vmatprep.subr.mxu0 %v3430_v4 }
 0x11c   : > { %3295 = vmatpush3.msk.msra.mxu1 %vm428_vm1, %v3717_v48  ;;  %3296 = vmatprep.mubr.msk.f32.mxu1 %vm3431_vm2, %v3430_v4 }
 0x11d   : > { %3304 = vmatprep.subr.mxu1 %v3430_v4 }
 0x11e   : > { %3322 = vmatpush3.xpose.msk.msra.mxu0 %vm227_vm0, %v2812_v56 }
 0x11f   : > { %3297 = vmatmul.mubr.msk.f32.vlgmr.msra.gmra.mxu1 %vm425_vm3, %v3636_v34 }
 0x120   : > { %3305 = vmatpush3.msk.msra.mxu1 %vm428_vm1, %v3734_v51  ;;  %3306 = vmatprep.mubr.msk.f32.mxu1 %vm3431_vm2, %v3430_v4 }
 0x121   : > { %3314 = vmatprep.subr.mxu1 %v3430_v4 }
 0x123   : > { %3307 = vmatmul.mubr.msk.f32.vlgmr.msra.gmra.mxu1 %vm425_vm3, %v3663_v39 }
 0x124   : > { %3315 = vmatpush3.msk.msra.mxu1 %vm428_vm1, %v424_v53  ;;  %3316 = vmatprep.mubr.msk.f32.mxu1 %vm3431_vm2, %v3430_v4 }
 0x127   : > { %3317 = vmatmul.mubr.msk.f32.vlgmr.msra.gmra.mxu1 %vm425_vm3, %v3693_v44 }
 0x1a3   : > { %v498_v57 = vpop.f32.mrf.mxu1 }
 0x1a5   : > { %v3163_v58 = vpop.f32.mrf.mxu1  ;;  %v798_v59 = vpop.f32.mrf.mxu0 }
 0x1a7   : > { %v573_v60 = vpop.f32.mrf.mxu1  ;;  %v3183_v61 = vpop.f32.mrf.mxu0 }
 0x1a9   : > { %v3168_v62 = vpop.f32.mrf.mxu1  ;;  %v948_v63 = vpop.f32.mrf.mxu0 }
 0x1ab   : > { %v648_v0 = vpop.f32.mrf.mxu1  ;;  %v3193_v1 = vpop.f32.mrf.mxu0 }
 0x1ad   : > { %v3173_v2 = vpop.f32.mrf.mxu1  ;;  %v1098_v3 = vpop.f32.mrf.mxu0 }
 0x1ae   : > { %v1627_v22 = vsub.f32 %v498_v57, %v1098_v3 }
 0x1af   : > { %v723_v5 = vpop.f32.mrf.mxu1  ;;  %v3203_v6 = vpop.f32.mrf.mxu0 }
 0x1b1   : > { %v3178_v4 = vpop.f32.mrf.mxu1  ;;  %v1248_v7 = vpop.f32.mrf.mxu0 }
 0x1b2   : > { %v1629_v19 = vsub.f32 %v648_v0, %v1248_v7 }
 0x1b3   : > { %v873_v8 = vpop.f32.mrf.mxu1  ;;  %v3213_v9 = vpop.f32.mrf.mxu0 }
 0x1b4   : > { %v2766_v28 = vrot.slane %v1629_v19, 6 }
 0x1b5   : > { %v3188_v10 = vpop.f32.mrf.mxu1  ;;  %v1398_v11 = vpop.f32.mrf.mxu0 }
 0x1b6   : > { %v1631_v29 = vsub.f32 %v798_v59, %v1398_v11 }
 0x1b7   : > { %v1023_v12 = vpop.f32.mrf.mxu1  ;;  %v3223_v13 = vpop.f32.mrf.mxu0 }
 0x1b8   : > { %v2772_v38 = vrot.slane %v1631_v29, 4 }
 0x1b9   : > { %v3198_v14 = vpop.f32.mrf.mxu1  ;;  %v1548_v15 = vpop.f32.mrf.mxu0 }
 0x1ba   : > { %v1633_v39 = vsub.f32 %v948_v63, %v1548_v15 }
 0x1bb   : > { %v1173_v16 = vpop.f32.mrf.mxu1  ;;  %v3233_v17 = vpop.f32.mrf.mxu0 }
 0x1bc   : > { %v1628_v18 = vsub.f32 %v573_v60, %v1173_v16  ;;  %v2778_v48 = vrot.slane %v1633_v39, 2 }
 0x1bd   : > { %v3208_v20 = vpop.f32.mrf.mxu1  ;;  %v3859_v21 = vpop.f32.mrf.mxu0 }
 0x1be   : > { %v2763_v23 = vrot.slane %v1628_v18, 7 }
 0x1bf   : > { %v1323_v24 = vpop.f32.mrf.mxu1  ;;  %v3243_v25 = vpop.f32.mrf.mxu0 }
 0x1c0   : > { %v2765_v26 = vsel %vm2764_vm4, %v2763_v23, %v1627_v22  ;;  %v1630_v27 = vsub.f32 %v723_v5, %v1323_v24 }
 0x1c1   : > { %v3218_v30 = vpop.f32.mrf.mxu1  ;;  %v1841_v31 = vpop.f32.mrf.mxu0  ;;  %v2768_v33 = vsel %vm2767_vm5, %v2766_v28, %v2765_v26 }
 0x1c2   : > { %v2769_v32 = vrot.slane %v1630_v27, 5 }
 0x1c3   : > { %v1473_v34 = vpop.f32.mrf.mxu1  ;;  %v3253_v35 = vpop.f32.mrf.mxu0 }
 0x1c4   : > { %v2771_v36 = vsel %vm2770_vm6, %v2769_v32, %v2768_v33  ;;  %v1632_v37 = vsub.f32 %v873_v8, %v1473_v34 }
 0x1c5   : > { %v3228_v40 = vpop.f32.mrf.mxu1  ;;  %v1981_v41 = vpop.f32.mrf.mxu0  ;;  %v2774_v43 = vsel %vm2773_vm7, %v2772_v38, %v2771_v36 }
 0x1c6   : > { %v2775_v42 = vrot.slane %v1632_v37, 3 }
 0x1c7   : > { %v1623_v44 = vpop.f32.mrf.mxu1  ;;  %v3263_v45 = vpop.f32.mrf.mxu0 }
 0x1c8   : > { %v2777_v46 = vsel %vm2776_vm8, %v2775_v42, %v2774_v43  ;;  %v1634_v47 = vsub.f32 %v1023_v12, %v1623_v44 }
 0x1c9   : > { %v3238_v49 = vpop.f32.mrf.mxu1  ;;  %v2121_v50 = vpop.f32.mrf.mxu0  ;;  %v2780_v52 = vsel %vm2779_vm9, %v2778_v48, %v2777_v46 }
 0x1ca   : > { %v2781_v51 = vrot.slane %v1634_v47, 1 }
 0x1cb   : > { %v1771_v53 = vpop.f32.mrf.mxu1  ;;  %v3273_v54 = vpop.f32.mrf.mxu0 }
 0x1cc   : > { %v2783_v55 = vsel %vm2782_vm10, %v2781_v51, %v2780_v52 }
 0x1cd   : > { %2785 = vst.msk [vmem:[#allocation2] sm:$0xff] %vm425_vm3, %v2783_v55  ;;  %v3248_v56 = vpop.f32.mrf.mxu1  ;;  %v2261_v57 = vpop.f32.mrf.mxu0 }
 0x1ce   : > { %v2262_v12 = vadd.f32 %v2261_v57, %v3859_v21 }
 0x1cf   : > { %v1911_v58 = vpop.f32.mrf.mxu1  ;;  %v3283_v59 = vpop.f32.mrf.mxu0 }
 0x1d1   : > { %v3258_v60 = vpop.f32.mrf.mxu1  ;;  %v2401_v61 = vpop.f32.mrf.mxu0 }
 0x1d2   : > { %v2402_v10 = vadd.f32 %v2401_v61, %v1841_v31 }
 0x1d3   : > { %v2051_v62 = vpop.f32.mrf.mxu1  ;;  %v3293_v63 = vpop.f32.mrf.mxu0 }
 0x1d4   : > { %v2810_v0 = vld [vmem:[#allocation2] sm:$0xff]  ;;  %v2796_v17 = vrot.slane %v2402_v10, 6 }
 0x1d5   : > { %v2541_v1 = vpop.f32.mrf.mxu0  ;;  %2814 = vxpose.xlu0.b32.start [1/2] (short) (narrow) %v2810_v0, 8  ;;  %v3268_v2 = vpop.f32.mrf.mxu1 }
 0x1d6   : > { %v2542_v18 = vadd.f32 %v2541_v1, %v1981_v41 }
 0x1d7   : > { %v2191_v3 = vpop.f32.mrf.mxu1  ;;  %v3303_v5 = vpop.f32.mrf.mxu0 }
 0x1d8   : > { %v2800_v26 = vrot.slane %v2542_v18, 4 }
 0x1d9   : > { %v3278_v6 = vpop.f32.mrf.mxu1  ;;  %v2681_v4 = vpop.f32.mrf.mxu0 }
 0x1da   : > { %v2682_v27 = vadd.f32 %v2681_v4, %v2121_v50 }
 0x1db   : > { %v2331_v7 = vpop.f32.mrf.mxu1  ;;  %v3313_v8 = vpop.f32.mrf.mxu0 }
 0x1dc   : > { %v2332_v9 = vadd.f32 %v2331_v7, %v1771_v53  ;;  %v2804_v33 = vrot.slane %v2682_v27, 2 }
 0x1dd   : > { %v3288_v11 = vpop.f32.mrf.mxu1 }
 0x1de   : > { %v2794_v13 = vrot.slane %v2332_v9, 7 }
 0x1df   : > { %v2471_v14 = vpop.f32.mrf.mxu1 }
 0x1e0   : > { %v2795_v15 = vsel %vm2764_vm4, %v2794_v13, %v2262_v12  ;;  %v2472_v16 = vadd.f32 %v2471_v14, %v1911_v58 }
 0x1e1   : > { %v3298_v19 = vpop.f32.mrf.mxu1  ;;  %v2797_v22 = vsel %vm2767_vm5, %v2796_v17, %v2795_v15 }
 0x1e2   : > { %v2798_v20 = vrot.slane %v2472_v16, 5 }
 0x1e3   : > { %v2611_v23 = vpop.f32.mrf.mxu1 }
 0x1e4   : > { %v2799_v24 = vsel %vm2770_vm6, %v2798_v20, %v2797_v22  ;;  %v2612_v25 = vadd.f32 %v2611_v23, %v2051_v62 }
 0x1e5   : > { %v3308_v28 = vpop.f32.mrf.mxu1  ;;  %v2801_v29 = vsel %vm2773_vm7, %v2800_v26, %v2799_v24 }
 0x1e6   : > { %v2802_v21 = vrot.slane %v2612_v25, 3 }
 0x1e7   : > { %v2751_v30 = vpop.f32.mrf.mxu1 }
 0x1e8   : > { %v2803_v31 = vsel %vm2776_vm8, %v2802_v21, %v2801_v29  ;;  %v2752_v32 = vadd.f32 %v2751_v30, %v2191_v3 }
 0x1e9   : > { %v3318_v34 = vpop.f32.mrf.mxu1  ;;  %v2805_v36 = vsel %vm2779_vm9, %v2804_v33, %v2803_v31 }
 0x1ea   : > { %v2806_v35 = vrot.slane %v2752_v32, 1 }
 0x1ec   : > { %v2807_v37 = vsel %vm2782_vm10, %v2806_v35, %v2805_v36 }
 0x1ed   : > { %2809 = vst.msk [vmem:[#allocation2 + $0x8] sm:$0xff] %vm425_vm3, %v2807_v37 }
 0x1f4   : > { %v2811_v38 = vld [vmem:[#allocation2 + $0x8] sm:$0xff] }
 0x1f5   : > { %2815 = vxpose.xlu0.b32.end [2/2] (short) (narrow) %v2811_v38, 8 }
 0x26d   : > { %v2830_v39 = vpop.trf.xlu0 }
 0x26e   : > { %3324 = vmatmul.mubr.msk.f32.vlgmr.msra.gmra.mxu0 %vm227_vm0, %v2830_v39 }
 0x32e   : > { %v2921_v40 = vpop.f32.mrf.mxu0 }
 0x32f   : > { %2926 = vst.msk [vmem:[%s217_s30] sm:$0xf] %vm2925_vm11, %v2921_v40 }
 0x330   : > { %v3325_v41 = vpop.f32.mrf.mxu0 }
 0x331   : > { %3381 = shalt.err (!%p3378_p3)
}
 0x332   : > { %s3382_s14 = scalar_lea.hbm %s3884_s9, 64  ;;  %s3386_s17 = scalar_lea.hbm %s3930_s5, 128 }
 0x333   : > { %p3383_p4 = scmp.ne.s32.totalorder %s3884_s9, %s3382_s14  ;;  %p3387_p9 = scmp.lt.s32.totalorder %s3884_s9, %s3930_s5 }
 0x334   : > { %p3388_p10 = scmp.lt.s32.totalorder %s3386_s17, %s3382_s14 }
 0x335   : > { %p3384_p7 = pnand %p3383_p4, %p3502_p5 }
 0x336   : > { %p3389_p11 = por %p3388_p10, %p3387_p9 }
 0x337   : > { %p3385_p8 = pneg %p3384_p7 }
 0x339   : > { %p3390_p12 = pnand %p3389_p11, %p3385_p8 }
 0x33b   : > { %3393 = shalt.err (!%p3390_p12)
}
 0x33c   : > { %3326 = dma.vmem_to_hbm [thread:$0]  (%p3502_p5), %s3886_s6, 64, %s3884_s9, %s2928_s10  }
 0x33d PF: > { %p3332_p13 = scmp.ge.s32.totalorder %s3428_s21, 2  ;;  %s2953_s26 = sand.u32 1, %s3416_s18  }
 0x33e   : > { %s2954_s30 = scalar_lea.sflag [#allocation4], %s2953_s26 }
 0x33f   : > { %p3329_p0 = pnand %p3332_p13, %p3506_p6 }
 0x341   : > { %p3330_p1 = pneg %p3329_p0 }
 0x343   : > { %3411 = dma.done.wait (%p3330_p1), %s2954_s30, 64  }
 0x344   : > { %3413 = vsyncadd (%p3330_p1), %s2954_s30, 4294967232  ;;  %p15_p2 = scmp.ge.s32.totalorder %s3489_s24, 4   ;;  %s3933_s18 = smov %s3420_s19 }
 0x345   : > { %s3934_s19 = smov %s3424_s20  ;;  %s3935_s20 = smov %s3500_s27 }
 0x346   : > { %s3936_s21 = smov %s3489_s24  ;;  %17 = sbr.rel (!%p15_p2) target bundleno = 3 (0x3), region = 75 }
 0x34b   :  { %2959 = vsyncpa [#allocation4], 1 }
 0x34c   :  { %2961 = vsyncpa [#allocation4 + $0x1], 1 }

</bundles_post_ra>
